<compile_context>
chip_gen: v7x
topology: tpu7x:2x2x1
jax: 0.10.0
libtpu: 0.0.40
codegen_flags: <defaults>
</compile_context>

<pallas_src>
import functools

import numpy as np

import jax
import jax.numpy as jnp
from jax import lax
from jax.experimental import pallas as pl
from jax.experimental.pallas import tpu as pltpu

NEG = -1.0e30   # finite "minus infinity" (avoids inf-inf NaNs in logsumexp)
SUB = 16        # batch elements (CTC lattices) packed per grid step


def _attn_ctc_kernel(tmax_sref, x_ref, g_ref, klen_ref, qlen_ref,
                     out_ref, em_ref, alpha_ref, *, blank: float):
    """One (batch-block, time-chunk) grid step.

    tmax_sref: (nblk,) int32 SMEM   per-block max query length
    x_ref:     (Tc, SUB, K) f32     attention logprobs (classes 1..K)
    g_ref:     (K, S_pad)   f32     one-hot: class k -> extended state 2k+1
    klen_ref:  (SUB, 1) int32       key (target) lengths
    qlen_ref:  (SUB, 1) int32       query (input) lengths
    out_ref:   (SUB, 128) f32       per-element cost (broadcast over lanes)
    em_ref:    (Tc, SUB, S_pad) f32 scratch: per-chunk emission log-probs
    alpha_ref: (SUB, S_pad) f32     scratch: CTC forward variables
    """
    g = pl.program_id(0)
    c = pl.program_id(1)
    nct = pl.num_programs(1)

    Tc, nsub, K = x_ref.shape
    S_pad = g_ref.shape[1]

    klen_col = klen_ref[...]                             # (SUB, 1) int32
    qlen_col = qlen_ref[...]                             # (SUB, 1) int32

    s_idx = lax.broadcasted_iota(jnp.int32, (1, S_pad), 1)
    even2d = (s_idx % 2) == 0
    ge1 = s_idx >= 1
    # s-2 transition only for odd (non-blank) states; valid because the
    # attention-CTC targets 1..K are all distinct.
    ge2odd = jnp.logical_and(s_idx >= 2, jnp.logical_not(even2d))
    svalid = s_idx <= 2 * klen_col                       # (SUB, S_pad)

    t0 = c * Tc
    tmax = tmax_sref[g]

    # ---- init alpha with a "virtual t=-1" state so the t=0 update is uniform:
    #      alpha_{-1}[0] = 0, else NEG  =>  alpha_0[s] = emission(0, s) for s<=1
    @pl.when(c == 0)
    def _():
        alpha_ref[...] = jnp.broadcast_to(
            jnp.where(s_idx == 0, 0.0, NEG), alpha_ref.shape).astype(jnp.float32)

    # ---- skip all compute for time chunks past this block's longest query
    @pl.when(t0 < tmax)
    def _():
        # masked log-softmax over {blank} U {classes 0..klen-1}, whole chunk
        x = x_ref[...]                                   # (Tc, SUB, K)
        kidx = lax.broadcasted_iota(jnp.int32, (1, nsub, K), 2)
        kmask = kidx < klen_col[None]                    # (1, SUB, K)
        xm = jnp.where(kmask, x, NEG)
        m = jnp.maximum(jnp.max(xm, axis=-1, keepdims=True), jnp.float32(blank))
        se = jnp.sum(jnp.exp(xm - m), axis=-1, keepdims=True) + jnp.exp(blank - m)
        logZ = m + jnp.log(se)                           # (Tc, SUB, 1)

        # batched emission matmul for the whole chunk (hoisted off the serial
        # critical path); invalid classes are killed afterwards by svalid.
        logp = (x - logZ).reshape(Tc * nsub, K)
        e = jnp.dot(logp, g_ref[...], preferred_element_type=jnp.float32)
        e = e.reshape(Tc, nsub, S_pad)
        e = jnp.where(even2d[None], blank - logZ, e)     # even states emit blank
        e = jnp.where(svalid[None], e, NEG)              # invalid states -> NEG
        em_ref[...] = e

        # CTC forward (alpha) recursion over this chunk, SUB lattices per vreg
        def body(i, alpha):
            em = em_ref[i]                               # (SUB, S_pad)
            p0 = alpha
            p1 = jnp.where(ge1, pltpu.roll(alpha, shift=1, axis=1), NEG)
            p2 = jnp.where(ge2odd, pltpu.roll(alpha, shift=2, axis=1), NEG)
            mx = jnp.maximum(jnp.maximum(p0, p1), p2)
            lse = mx + jnp.log(jnp.exp(p0 - mx) + jnp.exp(p1 - mx)
                               + jnp.exp(p2 - mx))
            new_alpha = jnp.maximum(em + lse, NEG)
            t_abs = t0 + i
            return jnp.where(t_abs < qlen_col, new_alpha, alpha)

        n_t = jnp.minimum(Tc, tmax - t0)                 # trip count this chunk
        alpha_ref[...] = lax.fori_loop(0, n_t, body, alpha_ref[...])

    # ---- finalize: -logsumexp(alpha[S-1], alpha[S-2]) with S = 2*klen + 1
    @pl.when(c == nct - 1)
    def _():
        alpha = alpha_ref[...]
        fmask = jnp.logical_or(s_idx == 2 * klen_col, s_idx == 2 * klen_col - 1)
        vals = jnp.where(fmask, alpha, NEG)
        mf = jnp.max(vals, axis=1, keepdims=True)
        lse_f = mf + jnp.log(jnp.sum(jnp.exp(vals - mf), axis=1, keepdims=True))
        loss = -lse_f                                    # (SUB, 1)
        # nn.CTCLoss(zero_infinity=True): infeasible alignment -> 0
        loss = jnp.where(jnp.logical_or(loss > 1e20, jnp.isnan(loss)), 0.0, loss)
        # reduction='mean' with per-call batch of 1 -> divide by target length
        cost = loss / jnp.maximum(klen_col, 1).astype(jnp.float32)
        out_ref[...] = jnp.broadcast_to(cost, out_ref.shape)


def attention_ctc_loss(attn_logprob, in_lens, out_lens, blank_logprob=-1.0):
    """Pallas equivalent of AttentionCTCLoss.forward."""
    B, C, T_max, K_max = attn_logprob.shape
    assert C == 1, "attention logprob channel dim must be 1"
    Bp = ((B + SUB - 1) // SUB) * SUB
    nblk = Bp // SUB
    S_pad = max(128, ((2 * K_max + 1 + 127) // 128) * 128)

    # Pick a T chunk so the per-step working set (x block x2 + emission scratch)
    # stays well under the scoped-VMEM defaults of every TPU generation.
    t_chunk = 128
    while t_chunk > 8 and (3 * t_chunk * SUB * K_max
                           + t_chunk * SUB * S_pad) * 4 > (8 << 20):
        t_chunk //= 2
    t_chunk = max(1, min(t_chunk, T_max))
    nct = -(-T_max // t_chunk)
    T_pad = nct * t_chunk

    in_lens = jnp.asarray(in_lens, jnp.int32)
    out_lens = jnp.asarray(out_lens, jnp.int32)

    # sort by query length so each SUB-element block has a tight loop bound
    order = jnp.argsort(out_lens)
    x = jnp.take(attn_logprob[:, 0, :, :].astype(jnp.float32), order, axis=0)
    il = jnp.take(in_lens, order)
    ol = jnp.take(out_lens, order)

    # pad batch to a multiple of SUB and time to a multiple of t_chunk
    pad = Bp - B
    x = jnp.pad(x, ((0, pad), (0, T_pad - T_max), (0, 0)))
    il = jnp.pad(il, (0, pad), constant_values=1)
    ol = jnp.pad(ol, (0, pad), constant_values=1)

    # interleave blocks (short,long,short,long,...) so a contiguous megacore
    # split of the "parallel" block axis gets balanced total work (v7x)
    half = (nblk + 1) // 2
    blk_order = np.empty(nblk, dtype=np.int64)
    blk_order[0::2] = np.arange(half)
    blk_order[1::2] = np.arange(nblk - 1, half - 1, -1)
    elem_order = (blk_order[:, None] * SUB + np.arange(SUB)[None, :]).reshape(-1)
    valid = jnp.asarray(elem_order < B)                  # real vs padded rows

    elem_idx = jnp.asarray(elem_order.astype(np.int32))
    x = jnp.take(x, elem_idx, axis=0)                    # (Bp, T_pad, K_max)
    il = jnp.take(il, elem_idx)
    ol = jnp.take(ol, elem_idx)

    # time-leading, batch-on-sublane layout
    x = jnp.transpose(x, (1, 0, 2))                      # (T_pad, Bp, K_max)
    il2 = il.reshape(Bp, 1)
    ol2 = ol.reshape(Bp, 1)
    tmax_blk = jnp.max(ol.reshape(nblk, SUB), axis=1)    # (nblk,) loop bounds

    # grid-invariant one-hot expansion matrix: class k -> extended state 2k+1
    s = np.arange(S_pad)
    k = np.arange(K_max)
    G = jnp.asarray(((s[None, :] % 2 == 1)
                     & (k[:, None] == (s[None, :] - 1) // 2)).astype(np.float32))

    # explicit VMEM budget (footprint + headroom), safe on v5e/v6e/v7x
    xblk = t_chunk * SUB * K_max * 4
    vmem_bytes = (2 * xblk + 2 * K_max * S_pad * 4
                  + t_chunk * SUB * S_pad * 4 + SUB * S_pad * 4
                  + 4 * SUB * 128 * 4 + (1 << 20))
    vmem_limit = int(min(48 << 20, max(8 << 20, 2 * vmem_bytes)))

    grid_spec = pltpu.PrefetchScalarGridSpec(
        num_scalar_prefetch=1,                           # per-block tmax -> SMEM
        grid=(nblk, nct),
        in_specs=[
            pl.BlockSpec((t_chunk, SUB, K_max), lambda g, c, tb: (c, g, 0)),
            pl.BlockSpec((K_max, S_pad), lambda g, c, tb: (0, 0)),
            pl.BlockSpec((SUB, 1), lambda g, c, tb: (g, 0)),
            pl.BlockSpec((SUB, 1), lambda g, c, tb: (g, 0)),
        ],
        out_specs=pl.BlockSpec((SUB, 128), lambda g, c, tb: (g, 0)),
        scratch_shapes=[
            pltpu.VMEM((t_chunk, SUB, S_pad), jnp.float32),   # emission chunk
            pltpu.VMEM((SUB, S_pad), jnp.float32),            # alpha carry
        ],
    )

    out = pl.pallas_call(
        functools.partial(_attn_ctc_kernel, blank=float(blank_logprob)),
        out_shape=jax.ShapeDtypeStruct((Bp, 128), jnp.float32),
        grid_spec=grid_spec,
        compiler_params=pltpu.CompilerParams(
            dimension_semantics=("parallel", "arbitrary"),
            vmem_limit_bytes=vmem_limit),
    )(tmax_blk, x, G, il2, ol2)

    # per-element costs live in column 0; mask out the padded rows and average
    return jnp.sum(jnp.where(valid, out[:, 0], 0.0)) / B


# ----------------------------- numpy reference -----------------------------
def _log_softmax_np(x, axis=-1):
    m = x.max(axis=axis, keepdims=True)
    return x - m - np.log(np.exp(x - m).sum(axis=axis, keepdims=True))


def _ctc_nll_np(logp, targets):
    """logp: (T, C) log-probs; targets: (K,) labels with blank = 0."""
    T, _ = logp.shape
    K = len(targets)
    S = 2 * K + 1
    ext = np.zeros(S, dtype=np.int64)
    ext[1::2] = targets
    neg_inf = -np.inf

    def lse(cands):
        cands = [c for c in cands if c > neg_inf]
        if not cands:
            return neg_inf
        mx = max(cands)
        return mx + np.log(sum(np.exp(c - mx) for c in cands))

    alpha = np.full(S, neg_inf)
    alpha[0] = logp[0, ext[0]]
    if S > 1:
        alpha[1] = logp[0, ext[1]]
    for t in range(1, T):
        new = np.full(S, neg_inf)
        for s in range(S):
            cands = [alpha[s]]
            if s >= 1:
                cands.append(alpha[s - 1])
            if s >= 2 and ext[s] != 0 and ext[s] != ext[s - 2]:
                cands.append(alpha[s - 2])
            new[s] = logp[t, ext[s]] + lse(cands)
        alpha = new
    ll = lse([alpha[S - 1], alpha[S - 2]])
    return -ll


def attention_ctc_loss_reference(attn_logprob, in_lens, out_lens, blank_logprob=-1.0):
    attn = np.asarray(attn_logprob, dtype=np.float64)
    B = attn.shape[0]
    total = 0.0
    for b in range(B):
        K = int(in_lens[b])
        T = int(out_lens[b])
        x = attn[b, 0, :T, :K]
        x = np.concatenate([np.full((T, 1), blank_logprob), x], axis=1)
        logp = _log_softmax_np(x, axis=1)
        nll = _ctc_nll_np(logp, np.arange(1, K + 1))
        if not np.isfinite(nll):   # zero_infinity=True
            nll = 0.0
        total += nll / K           # reduction='mean' with batch of 1
    return total / B


if __name__ == "__main__":
    key = jax.random.PRNGKey(0)
    B, T_max, K_max = 2, 16, 8
    attn_logprob = jax.random.normal(key, (B, 1, T_max, K_max), dtype=jnp.float32)
    in_lens = jnp.array([6, 8], dtype=jnp.int32)     # key (text) lengths
    out_lens = jnp.array([12, 16], dtype=jnp.int32)  # query (mel) lengths

    cost = attention_ctc_loss(attn_logprob, in_lens, out_lens)
    cost = jax.block_until_ready(cost)

    ref = attention_ctc_loss_reference(
        np.asarray(attn_logprob), np.asarray(in_lens), np.asarray(out_lens))
    assert abs(float(cost) - float(ref)) <= 2e-3 * max(1.0, abs(float(ref))), \
        (float(cost), float(ref))
    print("KERNEL_OK")
</pallas_src>

<mosaic_0001>
module attributes {stable_mosaic.version = 11 : i64} {
  func.func @_attn_ctc_kernel(%arg0: i32, %arg1: i32, %arg2: memref<1xi32, #tpu.memory_space<smem>>, %arg3: memref<16x16x8xf32, #tpu.memory_space<vmem>>, %arg4: memref<8x128xf32, #tpu.memory_space<vmem>>, %arg5: memref<16x1xi32, #tpu.memory_space<vmem>>, %arg6: memref<16x1xi32, #tpu.memory_space<vmem>>, %arg7: memref<16x128xf32, #tpu.memory_space<vmem>>, %arg8: memref<16x16x128xf32, #tpu.memory_space<vmem>>, %arg9: memref<16x128xf32, #tpu.memory_space<vmem>>) attributes {dimension_semantics = [#tpu.dimension_semantics<parallel>, #tpu.dimension_semantics<arbitrary>], iteration_bounds = array<i64: 1, 1>, scalar_prefetch = 1 : i64, scratch_operands = 2 : i64, tpu.core_type = #tpu.core_type<tc>, window_params = [{transform_indices = @transform_0, window_bounds = array<i64: 16, 16, 8>}, {pipeline_mode = #tpu.pipeline_mode<synchronous>, transform_indices = @transform_1, window_bounds = array<i64: 8, 128>}, {transform_indices = @transform_2, window_bounds = array<i64: 16, 1>}, {transform_indices = @transform_3, window_bounds = array<i64: 16, 1>}, {transform_indices = @transform_4, window_bounds = array<i64: 16, 128>}]} {
    %c0 = arith.constant 0 : index
    %c0_0 = arith.constant 0 : index
    %0 = vector.load %arg5[%c0, %c0_0] : memref<16x1xi32, #tpu.memory_space<vmem>>, vector<16x1xi32>
    %c0_1 = arith.constant 0 : index
    %c0_2 = arith.constant 0 : index
    %1 = vector.load %arg6[%c0_1, %c0_2] : memref<16x1xi32, #tpu.memory_space<vmem>>, vector<16x1xi32>
    %2 = tpu.iota {dimensions = array<i32: 1>} : vector<1x128xi32>
    %c2_i32 = arith.constant 2 : i32
    %c0_i32 = arith.constant 0 : i32
    %3 = arith.cmpi eq, %c2_i32, %c0_i32 : i32
    %c1_i32 = arith.constant 1 : i32
    %4 = arith.select %3, %c1_i32, %c2_i32 : i32
    %5 = vector.broadcast %4 : i32 to vector<1x128xi32>
    %6 = arith.remsi %2, %5 : vector<1x128xi32>
    %c0_i32_3 = arith.constant 0 : i32
    %7 = vector.broadcast %c0_i32_3 : i32 to vector<1x128xi32>
    %8 = arith.cmpi ne, %6, %7 : vector<1x128xi32>
    %c0_i32_4 = arith.constant 0 : i32
    %9 = vector.broadcast %c0_i32_4 : i32 to vector<1x128xi32>
    %10 = arith.cmpi slt, %6, %9 : vector<1x128xi32>
    %c0_i32_5 = arith.constant 0 : i32
    %11 = arith.cmpi slt, %4, %c0_i32_5 : i32
    %12 = vector.broadcast %11 : i1 to vector<1x128xi1>
    %13 = vector.broadcast %12 : vector<1x128xi1> to vector<1x128xi1>
    %14 = arith.xori %10, %13 : vector<1x128xi1>
    %15 = arith.andi %14, %8 : vector<1x128xi1>
    %16 = vector.broadcast %4 : i32 to vector<1x128xi32>
    %17 = arith.addi %6, %16 : vector<1x128xi32>
    %18 = arith.select %15, %17, %6 : vector<1x128xi1>, vector<1x128xi32>
    %c0_i32_6 = arith.constant 0 : i32
    %19 = vector.broadcast %c0_i32_6 : i32 to vector<1x128xi32>
    %20 = arith.cmpi eq, %18, %19 : vector<1x128xi32>
    %c1_i32_7 = arith.constant 1 : i32
    %21 = vector.broadcast %c1_i32_7 : i32 to vector<1x128xi32>
    %22 = arith.cmpi sge, %2, %21 : vector<1x128xi32>
    %c2_i32_8 = arith.constant 2 : i32
    %23 = vector.broadcast %c2_i32_8 : i32 to vector<1x128xi32>
    %24 = arith.cmpi sge, %2, %23 : vector<1x128xi32>
    %cst = arith.constant dense<true> : vector<1x128xi1>
    %25 = arith.xori %20, %cst : vector<1x128xi1>
    %26 = arith.andi %24, %25 : vector<1x128xi1>
    %c2_i32_9 = arith.constant 2 : i32
    %27 = vector.broadcast %c2_i32_9 : i32 to vector<16x1xi32>
    %28 = arith.muli %27, %0 : vector<16x1xi32>
    %29 = vector.broadcast %2 : vector<1x128xi32> to vector<16x128xi32>
    %30 = vector.broadcast %28 : vector<16x1xi32> to vector<16x128xi32>
    %31 = arith.cmpi sle, %29, %30 : vector<16x128xi32>
    %c16_i32 = arith.constant 16 : i32
    %32 = arith.muli %arg1, %c16_i32 : i32
    %33 = arith.index_cast %arg0 : i32 to index
    %34 = memref.load %arg2[%33] : memref<1xi32, #tpu.memory_space<smem>>
    %c0_i32_10 = arith.constant 0 : i32
    %35 = arith.cmpi eq, %arg1, %c0_i32_10 : i32
    %36 = arith.extui %35 : i1 to i32
    %c0_i32_11 = arith.constant 0 : i32
    %37 = arith.cmpi ne, %36, %c0_i32_11 : i32
    scf.if %37 {
      %c0_i32_15 = arith.constant 0 : i32
      %44 = vector.broadcast %c0_i32_15 : i32 to vector<1x128xi32>
      %45 = arith.cmpi eq, %2, %44 : vector<1x128xi32>
      %cst_16 = arith.constant 0.000000e+00 : f32
      %cst_17 = arith.constant -1.000000e+30 : f32
      %46 = vector.broadcast %cst_16 : f32 to vector<1x128xf32>
      %47 = vector.broadcast %cst_17 : f32 to vector<1x128xf32>
      %48 = arith.select %45, %46, %47 : vector<1x128xi1>, vector<1x128xf32>
      %49 = vector.shape_cast %48 : vector<1x128xf32> to vector<1x128xf32>
      %50 = vector.broadcast %49 : vector<1x128xf32> to vector<16x128xf32>
      %c0_18 = arith.constant 0 : index
      %c0_19 = arith.constant 0 : index
      %51 = vector.load %arg9[%c0_18, %c0_19] : memref<16x128xf32, #tpu.memory_space<vmem>>, vector<16x128xf32>
      tpu.vector_store %arg9[%c0_18, %c0_19], %50 {strides = array<i32>} : memref<16x128xf32, #tpu.memory_space<vmem>>, vector<16x128xf32>,
    } else {
    }
    %38 = arith.cmpi slt, %32, %34 : i32
    %39 = arith.extui %38 : i1 to i32
    %c0_i32_12 = arith.constant 0 : i32
    %40 = arith.cmpi ne, %39, %c0_i32_12 : i32
    scf.if %40 {
      %c0_15 = arith.constant 0 : index
      %c0_16 = arith.constant 0 : index
      %c0_17 = arith.constant 0 : index
      %44 = vector.load %arg3[%c0_15, %c0_16, %c0_17] : memref<16x16x8xf32, #tpu.memory_space<vmem>>, vector<16x16x8xf32>
      %45 = tpu.iota {dimensions = array<i32: 2>} : vector<1x16x8xi32>
      %46 = vector.shape_cast %0 : vector<16x1xi32> to vector<1x16x1xi32>
      %47 = vector.broadcast %46 : vector<1x16x1xi32> to vector<1x16x8xi32>
      %48 = arith.cmpi slt, %45, %47 : vector<1x16x8xi32>
      %cst_18 = arith.constant -1.000000e+30 : f32
      %49 = vector.shape_cast %48 : vector<1x16x8xi1> to vector<1x16x8xi1>
      %50 = vector.broadcast %49 : vector<1x16x8xi1> to vector<16x16x8xi1>
      %51 = vector.broadcast %cst_18 : f32 to vector<16x16x8xf32>
      %52 = arith.select %50, %44, %51 : vector<16x16x8xi1>, vector<16x16x8xf32>
      %cst_19 = arith.constant dense<0xFF800000> : vector<16x16xf32>
      %53 = vector.multi_reduction <maximumf>, %52, %cst_19 [2] : vector<16x16x8xf32> to vector<16x16xf32>
      %54 = vector.shape_cast %53 : vector<16x16xf32> to vector<16x16x1xf32>
      %cst_20 = arith.constant -1.000000e+00 : f32
      %55 = vector.broadcast %cst_20 : f32 to vector<16x16x1xf32>
      %56 = arith.maximumf %54, %55 : vector<16x16x1xf32>
      %57 = vector.broadcast %56 : vector<16x16x1xf32> to vector<16x16x8xf32>
      %58 = arith.subf %52, %57 : vector<16x16x8xf32>
      %59 = math.exp %58 : vector<16x16x8xf32>
      %cst_21 = arith.constant dense<0.000000e+00> : vector<16x16xf32>
      %60 = vector.multi_reduction <add>, %59, %cst_21 [2] : vector<16x16x8xf32> to vector<16x16xf32>
      %61 = vector.shape_cast %60 : vector<16x16xf32> to vector<16x16x1xf32>
      %cst_22 = arith.constant -1.000000e+00 : f32
      %62 = vector.broadcast %cst_22 : f32 to vector<16x16x1xf32>
      %63 = arith.subf %62, %56 : vector<16x16x1xf32>
      %64 = math.exp %63 : vector<16x16x1xf32>
      %65 = arith.addf %61, %64 : vector<16x16x1xf32>
      %66 = math.log %65 : vector<16x16x1xf32>
      %67 = arith.addf %56, %66 : vector<16x16x1xf32>
      %68 = vector.broadcast %67 : vector<16x16x1xf32> to vector<16x16x8xf32>
      %69 = arith.subf %44, %68 : vector<16x16x8xf32>
      %70 = vector.shape_cast %69 : vector<16x16x8xf32> to vector<256x8xf32>
      %c0_23 = arith.constant 0 : index
      %c0_24 = arith.constant 0 : index
      %71 = vector.load %arg4[%c0_23, %c0_24] : memref<8x128xf32, #tpu.memory_space<vmem>>, vector<8x128xf32>
      %cst_25 = arith.constant dense<0.000000e+00> : vector<256x128xf32>
      %72 = tpu.matmul %70, %71, %cst_25 {dimension_numbers = #tpu.dot_dimension_numbers<[1], [0], [0], [1], [0, 0, 1, 1], [], []>} : vector<256x8xf32>, vector<8x128xf32>, vector<256x128xf32> -> vector<256x128xf32>
      %73 = vector.shape_cast %72 : vector<256x128xf32> to vector<16x16x128xf32>
      %74 = vector.shape_cast %20 : vector<1x128xi1> to vector<1x1x128xi1>
      %cst_26 = arith.constant -1.000000e+00 : f32
      %75 = vector.broadcast %cst_26 : f32 to vector<16x16x1xf32>
      %76 = arith.subf %75, %67 : vector<16x16x1xf32>
      %77 = vector.shape_cast %74 : vector<1x1x128xi1> to vector<1x1x128xi1>
      %78 = vector.broadcast %77 : vector<1x1x128xi1> to vector<16x16x128xi1>
      %79 = vector.shape_cast %76 : vector<16x16x1xf32> to vector<16x16x1xf32>
      %80 = vector.broadcast %79 : vector<16x16x1xf32> to vector<16x16x128xf32>
      %81 = arith.select %78, %80, %73 : vector<16x16x128xi1>, vector<16x16x128xf32>
      %82 = vector.shape_cast %31 : vector<16x128xi1> to vector<1x16x128xi1>
      %cst_27 = arith.constant -1.000000e+30 : f32
      %83 = vector.shape_cast %82 : vector<1x16x128xi1> to vector<1x16x128xi1>
      %84 = vector.broadcast %83 : vector<1x16x128xi1> to vector<16x16x128xi1>
      %85 = vector.broadcast %cst_27 : f32 to vector<16x16x128xf32>
      %86 = arith.select %84, %81, %85 : vector<16x16x128xi1>, vector<16x16x128xf32>
      %c0_28 = arith.constant 0 : index
      %c0_29 = arith.constant 0 : index
      %c0_30 = arith.constant 0 : index
      %87 = vector.load %arg8[%c0_28, %c0_29, %c0_30] : memref<16x16x128xf32, #tpu.memory_space<vmem>>, vector<16x16x128xf32>
      tpu.vector_store %arg8[%c0_28, %c0_29, %c0_30], %86 {strides = array<i32>} : memref<16x16x128xf32, #tpu.memory_space<vmem>>, vector<16x16x128xf32>,
      %88 = arith.subi %34, %32 : i32
      %c16_i32_31 = arith.constant 16 : i32
      %89 = arith.minsi %c16_i32_31, %88 : i32
      %c0_32 = arith.constant 0 : index
      %c0_33 = arith.constant 0 : index
      %90 = vector.load %arg9[%c0_32, %c0_33] : memref<16x128xf32, #tpu.memory_space<vmem>>, vector<16x128xf32>
      %c0_i32_34 = arith.constant 0 : i32
      %91 = arith.subi %89, %c0_i32_34 : i32
      %92 = arith.addi %c0_i32_34, %91 : i32
      %c1_i32_35 = arith.constant 1 : i32
      %93 = scf.for %arg10 = %c0_i32_34 to %92 step %c1_i32_35 iter_args(%arg11 = %90) -> (vector<16x128xf32>)  : i32 {
        %95 = arith.index_cast %arg10 : i32 to index
        %c0_38 = arith.constant 0 : index
        %c0_39 = arith.constant 0 : index
        %96 = vector.load %arg8[%95, %c0_38, %c0_39] : memref<16x16x128xf32, #tpu.memory_space<vmem>>, vector<1x16x128xf32>
        %97 = vector.shape_cast %96 : vector<1x16x128xf32> to vector<16x128xf32>
        %c1_i32_40 = arith.constant 1 : i32
        %98 = tpu.dynamic_rotate %arg11 by %c1_i32_40 dim 1 : vector<16x128xf32>, i32 -> vector<16x128xf32>
        %cst_41 = arith.constant -1.000000e+30 : f32
        %99 = vector.shape_cast %22 : vector<1x128xi1> to vector<1x128xi1>
        %100 = vector.broadcast %99 : vector<1x128xi1> to vector<16x128xi1>
        %101 = vector.broadcast %cst_41 : f32 to vector<16x128xf32>
        %102 = arith.select %100, %98, %101 : vector<16x128xi1>, vector<16x128xf32>
        %c2_i32_42 = arith.constant 2 : i32
        %103 = tpu.dynamic_rotate %arg11 by %c2_i32_42 dim 1 : vector<16x128xf32>, i32 -> vector<16x128xf32>
        %cst_43 = arith.constant -1.000000e+30 : f32
        %104 = vector.shape_cast %26 : vector<1x128xi1> to vector<1x128xi1>
        %105 = vector.broadcast %104 : vector<1x128xi1> to vector<16x128xi1>
        %106 = vector.broadcast %cst_43 : f32 to vector<16x128xf32>
        %107 = arith.select %105, %103, %106 : vector<16x128xi1>, vector<16x128xf32>
        %108 = arith.maximumf %arg11, %102 : vector<16x128xf32>
        %109 = arith.maximumf %108, %107 : vector<16x128xf32>
        %110 = arith.subf %arg11, %109 : vector<16x128xf32>
        %111 = math.exp %110 : vector<16x128xf32>
        %112 = arith.subf %102, %109 : vector<16x128xf32>
        %113 = math.exp %112 : vector<16x128xf32>
        %114 = arith.addf %111, %113 : vector<16x128xf32>
        %115 = arith.subf %107, %109 : vector<16x128xf32>
        %116 = math.exp %115 : vector<16x128xf32>
        %117 = arith.addf %114, %116 : vector<16x128xf32>
        %118 = math.log %117 : vector<16x128xf32>
        %119 = arith.addf %109, %118 : vector<16x128xf32>
        %120 = arith.addf %97, %119 : vector<16x128xf32>
        %cst_44 = arith.constant -1.000000e+30 : f32
        %121 = vector.broadcast %cst_44 : f32 to vector<16x128xf32>
        %122 = arith.maximumf %120, %121 : vector<16x128xf32>
        %123 = arith.addi %32, %arg10 : i32
        %124 = vector.broadcast %123 : i32 to vector<16x1xi32>
        %125 = arith.cmpi slt, %124, %1 : vector<16x1xi32>
        %126 = vector.shape_cast %125 : vector<16x1xi1> to vector<16x1xi1>
        %127 = vector.broadcast %126 : vector<16x1xi1> to vector<16x128xi1>
        %128 = arith.select %127, %122, %arg11 : vector<16x128xi1>, vector<16x128xf32>
        scf.yield %128 : vector<16x128xf32>
      }
      %c0_36 = arith.constant 0 : index
      %c0_37 = arith.constant 0 : index
      %94 = vector.load %arg9[%c0_36, %c0_37] : memref<16x128xf32, #tpu.memory_space<vmem>>, vector<16x128xf32>
      tpu.vector_store %arg9[%c0_36, %c0_37], %93 {strides = array<i32>} : memref<16x128xf32, #tpu.memory_space<vmem>>, vector<16x128xf32>,
    } else {
    }
    %c0_i32_13 = arith.constant 0 : i32
    %41 = arith.cmpi eq, %arg1, %c0_i32_13 : i32
    %42 = arith.extui %41 : i1 to i32
    %c0_i32_14 = arith.constant 0 : i32
    %43 = arith.cmpi ne, %42, %c0_i32_14 : i32
    scf.if %43 {
      %c0_15 = arith.constant 0 : index
      %c0_16 = arith.constant 0 : index
      %44 = vector.load %arg9[%c0_15, %c0_16] : memref<16x128xf32, #tpu.memory_space<vmem>>, vector<16x128xf32>
      %c2_i32_17 = arith.constant 2 : i32
      %45 = vector.broadcast %c2_i32_17 : i32 to vector<16x1xi32>
      %46 = arith.muli %45, %0 : vector<16x1xi32>
      %47 = vector.broadcast %2 : vector<1x128xi32> to vector<16x128xi32>
      %48 = vector.broadcast %46 : vector<16x1xi32> to vector<16x128xi32>
      %49 = arith.cmpi eq, %47, %48 : vector<16x128xi32>
      %c2_i32_18 = arith.constant 2 : i32
      %50 = vector.broadcast %c2_i32_18 : i32 to vector<16x1xi32>
      %51 = arith.muli %50, %0 : vector<16x1xi32>
      %c1_i32_19 = arith.constant 1 : i32
      %52 = vector.broadcast %c1_i32_19 : i32 to vector<16x1xi32>
      %53 = arith.subi %51, %52 : vector<16x1xi32>
      %54 = vector.broadcast %2 : vector<1x128xi32> to vector<16x128xi32>
      %55 = vector.broadcast %53 : vector<16x1xi32> to vector<16x128xi32>
      %56 = arith.cmpi eq, %54, %55 : vector<16x128xi32>
      %57 = arith.ori %49, %56 : vector<16x128xi1>
      %cst_20 = arith.constant -1.000000e+30 : f32
      %58 = vector.broadcast %cst_20 : f32 to vector<16x128xf32>
      %59 = arith.select %57, %44, %58 : vector<16x128xi1>, vector<16x128xf32>
      %cst_21 = arith.constant dense<0xFF800000> : vector<16xf32>
      %60 = vector.multi_reduction <maximumf>, %59, %cst_21 [1] : vector<16x128xf32> to vector<16xf32>
      %61 = vector.shape_cast %60 : vector<16xf32> to vector<16x1xf32>
      %62 = vector.broadcast %61 : vector<16x1xf32> to vector<16x128xf32>
      %63 = arith.subf %59, %62 : vector<16x128xf32>
      %64 = math.exp %63 : vector<16x128xf32>
      %cst_22 = arith.constant dense<0.000000e+00> : vector<16xf32>
      %65 = vector.multi_reduction <add>, %64, %cst_22 [1] : vector<16x128xf32> to vector<16xf32>
      %66 = vector.shape_cast %65 : vector<16xf32> to vector<16x1xf32>
      %67 = math.log %66 : vector<16x1xf32>
      %68 = arith.addf %61, %67 : vector<16x1xf32>
      %cst_23 = arith.constant 0.000000e+00 : f32
      %69 = vector.broadcast %cst_23 : f32 to vector<16x1xf32>
      %70 = arith.subf %69, %68 : vector<16x1xf32>
      %cst_24 = arith.constant 1.000000e+20 : f32
      %71 = vector.broadcast %cst_24 : f32 to vector<16x1xf32>
      %72 = arith.cmpf ogt, %70, %71 : vector<16x1xf32>
      %73 = arith.cmpf one, %70, %70 : vector<16x1xf32>
      %74 = arith.ori %72, %73 : vector<16x1xi1>
      %cst_25 = arith.constant 0.000000e+00 : f32
      %75 = vector.broadcast %cst_25 : f32 to vector<16x1xf32>
      %76 = arith.select %74, %75, %70 : vector<16x1xi1>, vector<16x1xf32>
      %c1_i32_26 = arith.constant 1 : i32
      %77 = vector.broadcast %c1_i32_26 : i32 to vector<16x1xi32>
      %78 = arith.maxsi %0, %77 : vector<16x1xi32>
      %79 = arith.sitofp %78 : vector<16x1xi32> to vector<16x1xf32>
      %80 = arith.divf %76, %79 : vector<16x1xf32>
      %81 = vector.shape_cast %80 : vector<16x1xf32> to vector<16x1xf32>
      %82 = vector.broadcast %81 : vector<16x1xf32> to vector<16x128xf32>
      %c0_27 = arith.constant 0 : index
      %c0_28 = arith.constant 0 : index
      %83 = vector.load %arg7[%c0_27, %c0_28] : memref<16x128xf32, #tpu.memory_space<vmem>>, vector<16x128xf32>
      tpu.vector_store %arg7[%c0_27, %c0_28], %82 {strides = array<i32>} : memref<16x128xf32, #tpu.memory_space<vmem>>, vector<16x128xf32>,
    } else {
    }
    return
  }
  func.func @transform_0(%arg0: i32, %arg1: i32, %arg2: memref<1xi32, #tpu.memory_space<smem>>) -> (i32, i32, i32) {
    %c0_i32 = arith.constant 0 : i32
    %c0_i32_0 = arith.constant 0 : i32
    return %arg1, %arg0, %c0_i32 : i32, i32, i32
  }
  func.func @transform_1(%arg0: i32, %arg1: i32, %arg2: memref<1xi32, #tpu.memory_space<smem>>) -> (i32, i32) {
    %c0_i32 = arith.constant 0 : i32
    %c0_i32_0 = arith.constant 0 : i32
    %c0_i32_1 = arith.constant 0 : i32
    return %c0_i32, %c0_i32_0 : i32, i32
  }
  func.func @transform_2(%arg0: i32, %arg1: i32, %arg2: memref<1xi32, #tpu.memory_space<smem>>) -> (i32, i32) {
    %c0_i32 = arith.constant 0 : i32
    %c0_i32_0 = arith.constant 0 : i32
    return %arg0, %c0_i32 : i32, i32
  }
  func.func @transform_3(%arg0: i32, %arg1: i32, %arg2: memref<1xi32, #tpu.memory_space<smem>>) -> (i32, i32) {
    %c0_i32 = arith.constant 0 : i32
    %c0_i32_0 = arith.constant 0 : i32
    return %arg0, %c0_i32 : i32, i32
  }
  func.func @transform_4(%arg0: i32, %arg1: i32, %arg2: memref<1xi32, #tpu.memory_space<smem>>) -> (i32, i32) {
    %c0_i32 = arith.constant 0 : i32
    %c0_i32_0 = arith.constant 0 : i32
    return %arg0, %c0_i32 : i32, i32
  }
}

</mosaic_0001>

<bundles_post_ra>
// kernel: tpu_custom_call.1
= control target key start
LH: loop header
LB: loop body
LE: loop exit
PB: predicated region body
PF: predicated region fallthrough
CT: control target
= control target key end

     0   :  { %v24_v2 = vlaneseq  ;;  %v3015_v3 = vmov 0   ;;  %s3007_s0 = inlined_call_operand.<no memory space> [shape: s32[1], index: 0, kind: input, shape index: {}]   ;;  %s3008_s1 = inlined_call_operand.vmem [shape: f32[16,16,8], index: 1, kind: input, shape index: {}]   ;;  %s3009_s2 = inlined_call_operand.vmem [shape: f32[8,128], index: 2, kind: input, shape index: {}]   ;;  %s3010_s3 = inlined_call_operand.vmem [shape: s32[16,1], index: 3, kind: input, shape index: {}]   ;;  %s3011_s4 = inlined_call_operand.vmem [shape: s32[16,1], index: 4, kind: input, shape index: {}]   ;;  %s3012_s5 = inlined_call_operand.hbm [shape: f32[16,128], index: 5, kind: output, shape index: {}]  }
   0x1   :  { %v1900_v0 = vld [vmem:[%s3010_s3] sm:$0xff]  ;;  %v1905_v1 = vld [vmem:[%s3010_s3 + $0x8] sm:$0xff]  ;;  %1541 = vset.pattern.permute.xlu0 %v3015_v3 }
   0x2   :  { %3025 = vst [vmem:[#allocation9_spill] sm:$0xff] %v1900_v0  ;;  %3026 = vst [vmem:[#allocation10_spill] sm:$0xff] %v1905_v1  ;;  %v3014_v4 = vmul.u32 2, %v1900_v0 }
   0x3   :  { %11 = vsyncpa [#allocation7], 0  ;;  %v1909_v5 = vand.u32 127, %v24_v2  ;;  %v3013_v6 = vmul.u32 2, %v1905_v1  ;;  %v1858_v8 = vmov -1e+30  }
   0x4   :  { %46 = vperm.xlu0 %1541, %v3014_v4   ;;  %vm1859_vm4 = vmmov 1   ;;  %v1929_v11 = vld [vmem:[%s3011_s4] sm:$0xff]  ;;  %v1934_v12 = vld [vmem:[%s3011_s4 + $0x8] sm:$0xff]  ;;  %v3029_v13 = vmov 0  ;;  %p1366_p0 = scmp.le.s32.totalorder %s3007_s0, 0 }
   0x5   :  { %v30_v7 = vand.u32 1, %v1909_v5  ;;  %vm39_vm0 = vcmp.ge.s32.totalorder %v1909_v5, 1  ;;  %vm59_vm1 = vcmp.eq.s32.totalorder %v1909_v5, 0  ;;  %vm40_vm2 = vcmp.ge.s32.totalorder %v1909_v5, 2  ;;  %v1968_v19 = vld [vmem:[%s3008_s1] sm:$0xff] (!%p1366_p0)  ;;  %v1990_v25 = vld [vmem:[%s3008_s1 + $0x8] sm:$0xff] (!%p1366_p0) }
   0x6   :  { %v60_v9 = vsel %vm59_vm1, 0.0, %v1858_v8  ;;  %v1860_v18 = vmov (!%p1366_p0), 0   ;;  %vm143_vm9 = vcmask (!%p1366_p0), 64512   ;;  %v1978_v22 = vld [vmem:[%s3008_s1 + $0x80] sm:$0xff] (!%p1366_p0)  ;;  %v88_v29 = vld [vmem:[%s3008_s1 + $0xa8] sm:$0xff] (!%p1366_p0)  ;;  %v89_v36 = vld [vmem:[%s3008_s1 + $0xb0] sm:$0xff] (!%p1366_p0) }
   0x7   :  { %vm1918_vm3 = vcmp.eq.s32.totalorder %v30_v7, 0  ;;  %61 = vst [vmem:[#allocation3] sm:$0xff] %v60_v9  ;;  %62 = vst [vmem:[#allocation3 + $0x8] sm:$0xff] %v60_v9  ;;  %v2008_v30 = vld [vmem:[%s3008_s1 + $0x88] sm:$0xff] (!%p1366_p0)  ;;  %v2034_v37 = vld [vmem:[%s3008_s1 + $0x10] sm:$0xff] (!%p1366_p0)  ;;  %p1177_p1 = scmp.lt.s32.totalorder (!%p1366_p0), %s3007_s0, 16 }
   0x8   :  { %49 = vperm.xlu0 %1541, %v3013_v6   ;;  %vm41_vm5 = vmxor %vm1918_vm3, %vm1859_vm4  ;;  %v90_v42 = vld [vmem:[%s3008_s1 + $0xb8] sm:$0xff] (!%p1366_p0)  ;;  %v2055_v43 = vld [vmem:[%s3008_s1 + $0x90] sm:$0xff] (!%p1366_p0) }
   0x9   :  { %vm1936_vm6 = vmand %vm40_vm2, %vm41_vm5  ;;  %v91_v48 = vld [vmem:[%s3008_s1 + $0xc0] sm:$0xff] (!%p1366_p0)  ;;  %v70_v49 = vld [vmem:[%s3008_s1 + $0x18] sm:$0xff] (!%p1366_p0) }
   0xa   :  { %v3030_v13 = vsel %vm1936_vm6, 4294967295, %v3029_v13  ;;  %v92_v54 = vld [vmem:[%s3008_s1 + $0xc8] sm:$0xff] (!%p1366_p0)  ;;  %v86_v55 = vld [vmem:[%s3008_s1 + $0x98] sm:$0xff] (!%p1366_p0)  ;;  %v93_v60 = vld [vmem:[%s3008_s1 + $0xd0] sm:$0xff] (!%p1366_p0) }
   0xb   :  { %3031 = vst [vmem:[#allocation11_spill] sm:$0xff] %v3030_v13  ;;  %v71_v61 = vld [vmem:[%s3008_s1 + $0x20] sm:$0xff] (!%p1366_p0)  ;;  %v94_v8 = vld [vmem:[%s3008_s1 + $0xd8] sm:$0xff] (!%p1366_p0) }
   0xc   :  { %1542 = vset.pattern.permute.xlu0 (!%p1366_p0), %v1860_v18  ;;  %v87_v9 = vld [vmem:[%s3008_s1 + $0xa0] sm:$0xff] (!%p1366_p0) }
   0xd   :  { %100 = vperm.xlu0 (!%p1366_p0), %1542, %v1900_v0  }
  0x11   :  { %103 = vperm.xlu0 (!%p1366_p0), %1542, %v1905_v1  }
  0x82   :  { %66 = sbr.rel (%p1366_p0) target bundleno = 927 (0x39f), region = 25 }
  0x83   :  { %v1940_v14 = vpop.permute.xlu0 %46 }
  0x84   :  { %3032 = vst [vmem:[#allocation12_spill] sm:$0xff] %v1940_v14  ;;  %vm1944_vm7 = vcmp.le.s32.totalorder %v1909_v5, %v1940_v14 }
  0x87   :  { %v1948_v16 = vpop.permute.xlu0 %49 }
  0x88   :  { %3035 = vst [vmem:[#allocation13_spill] sm:$0xff] %v1948_v16  ;;  %vm1952_vm8 = vcmp.le.s32.totalorder %v1909_v5, %v1948_v16 }
  0x89   :  { %s2932_s16 = smov (!%p1366_p0), 0  }
  0x8c   :  { %v101_v20 = vpop.permute.xlu0 %100 }
  0x8d   :  { %vm1971_vm10 = vcmp.lt.s32.totalorder %v1909_v5, %v101_v20 }
  0x8e   :  { %v1983_v23 = vsel %vm1971_vm10, %v1968_v19, -1e+30  ;;  %v1995_v27 = vsel %vm1971_vm10, %v1978_v22, -1e+30  ;;  %v2042_v40 = vsel %vm1971_vm10, %v89_v36, -1e+30 }
  0x8f   :  { %v144_v24 = vsel %vm143_vm9, %v1983_v23, -inf  ;;  %v192_v33 = vsel %vm143_vm9, %v1995_v27, -inf  ;;  %v2047_v41 = vsel %vm1971_vm10, %v2034_v37, -1e+30  ;;  %v210_v44 = vsel %vm143_vm9, %v2042_v40, -inf }
  0x90   :  { %v104_v26 = vpop.permute.xlu0 %103  ;;  %145 = vmax.xlane.f32.xlu1 %v144_v24  ;;  %v150_v45 = vsel %vm143_vm9, %v2047_v41, -inf  ;;  %v2068_v47 = vsel %vm1971_vm10, %v2055_v43, -1e+30  ;;  %v2082_v52 = vsel %vm1971_vm10, %v91_v48, -1e+30 }
  0x91   :  { %vm1998_vm11 = vcmp.lt.s32.totalorder %v1909_v5, %v104_v26  ;;  %v198_v51 = vsel %vm143_vm9, %v2068_v47, -inf  ;;  %v216_v56 = vsel %vm143_vm9, %v2082_v52, -inf  ;;  %v2118_v2 = vsel %vm1971_vm10, %v93_v60, -1e+30 }
  0x92   :  { %v2013_v31 = vsel %vm1998_vm11, %v1990_v25, -1e+30  ;;  %v2021_v34 = vsel %vm1998_vm11, %v88_v29, -1e+30  ;;  %v2026_v35 = vsel %vm1998_vm11, %v2008_v30, -1e+30 }
  0x93   :  { %v147_v32 = vsel %vm143_vm9, %v2013_v31, -inf  ;;  %v207_v38 = vsel %vm143_vm9, %v2021_v34, -inf  ;;  %v195_v39 = vsel %vm143_vm9, %v2026_v35, -inf  ;;  %v2063_v46 = vsel %vm1998_vm11, %v90_v42, -1e+30  ;;  %v95_v29 = vld [vmem:[%s3008_s1 + $0xe0] sm:$0xff] }
  0x94   :  { %148 = vmax.xlane.f32.xlu0 %v147_v32  ;;  %193 = vmax.xlane.f32.xlu1 %v192_v33  ;;  %v213_v50 = vsel %vm143_vm9, %v2063_v46, -inf  ;;  %v2086_v53 = vsel %vm1998_vm11, %v70_v49, -1e+30  ;;  %v2100_v58 = vsel %vm1998_vm11, %v92_v54, -1e+30  ;;  %v222_v18 = vsel %vm143_vm9, %v2118_v2, -inf }
  0x95   :  { %v153_v57 = vsel %vm143_vm9, %v2086_v53, -inf  ;;  %v2104_v59 = vsel %vm1998_vm11, %v86_v55, -1e+30  ;;  %v219_v62 = vsel %vm143_vm9, %v2100_v58, -inf  ;;  %v2122_v7 = vsel %vm1971_vm10, %v71_v61, -1e+30 }
  0x96   :  { %v201_v63 = vsel %vm143_vm9, %v2104_v59, -inf  ;;  %v156_v20 = vsel %vm143_vm9, %v2122_v7, -inf  ;;  %v2136_v24 = vsel %vm1998_vm11, %v94_v8, -1e+30  ;;  %v2140_v26 = vsel %vm1971_vm10, %v87_v9, -1e+30 }
  0x97   :  { %v72_v32 = vld [vmem:[%s3008_s1 + $0x28] sm:$0xff]  ;;  %v225_v33 = vsel %vm143_vm9, %v2136_v24, -inf  ;;  %v204_v36 = vsel %vm143_vm9, %v2140_v26, -inf  ;;  %v74_v54 = vld [vmem:[%s3008_s1 + $0x38] sm:$0xff] }
  0x98   :  { %208 = vmax.xlane.f32.xlu0 %v207_v38  ;;  %196 = vmax.xlane.f32.xlu1 %v195_v39  ;;  %v2154_v38 = vsel %vm1971_vm10, %v95_v29, -1e+30  ;;  %v2158_v39 = vsel %vm1998_vm11, %v72_v32, -1e+30  ;;  %v96_v42 = vld [vmem:[%s3008_s1 + $0xe8] sm:$0xff]  ;;  %v98_v61 = vld [vmem:[%s3008_s1 + $0xf8] sm:$0xff] }
  0x99   :  { %v159_v48 = vsel %vm143_vm9, %v2158_v39, -inf  ;;  %v2172_v49 = vsel %vm1998_vm11, %v96_v42, -1e+30  ;;  %v2194_v60 = vsel %vm1998_vm11, %v74_v54, -1e+30  ;;  %v79_v54 = vld [vmem:[%s3008_s1 + $0x60] sm:$0xff] }
  0x9a   :  { %v231_v55 = vsel %vm143_vm9, %v2172_v49, -inf  ;;  %v165_v8 = vsel %vm143_vm9, %v2194_v60, -inf  ;;  %v2208_v9 = vsel %vm1998_vm11, %v98_v61, -1e+30  ;;  %v80_v61 = vld [vmem:[%s3008_s1 + $0x68] sm:$0xff] }
  0x9b   :  { %v237_v29 = vsel %vm143_vm9, %v2208_v9, -inf }
  0x9c   :  { %211 = vmax.xlane.f32.xlu0 %v210_v44  ;;  %151 = vmax.xlane.f32.xlu1 %v150_v45  ;;  %v73_v44 = vld [vmem:[%s3008_s1 + $0x30] sm:$0xff]  ;;  %v228_v45 = vsel %vm143_vm9, %v2154_v38, -inf }
  0xa0   :  { %214 = vmax.xlane.f32.xlu0 %v213_v50  ;;  %199 = vmax.xlane.f32.xlu1 %v198_v51  ;;  %v2176_v50 = vsel %vm1971_vm10, %v73_v44, -1e+30  ;;  %v97_v51 = vld [vmem:[%s3008_s1 + $0xf0] sm:$0xff] }
  0xa4   :  { %217 = vmax.xlane.f32.xlu0 %v216_v56  ;;  %154 = vmax.xlane.f32.xlu1 %v153_v57  ;;  %v162_v56 = vsel %vm143_vm9, %v2176_v50, -inf  ;;  %v2190_v57 = vsel %vm1971_vm10, %v97_v51, -1e+30 }
  0xa8   :  { %220 = vmax.xlane.f32.xlu0 %v219_v62  ;;  %202 = vmax.xlane.f32.xlu1 %v201_v63  ;;  %v75_v62 = vld [vmem:[%s3008_s1 + $0x40] sm:$0xff]  ;;  %v234_v63 = vsel %vm143_vm9, %v2190_v57, -inf }
  0xac   :  { %223 = vmax.xlane.f32.xlu0 %v222_v18  ;;  %157 = vmax.xlane.f32.xlu1 %v156_v20  ;;  %v2212_v18 = vsel %vm1971_vm10, %v75_v62, -1e+30  ;;  %v76_v20 = vld [vmem:[%s3008_s1 + $0x48] sm:$0xff] }
  0xad   :  { %v168_v32 = vsel %vm143_vm9, %v2212_v18, -inf }
  0xb0   :  { %226 = vmax.xlane.f32.xlu0 %v225_v33  ;;  %205 = vmax.xlane.f32.xlu1 %v204_v36  ;;  %v2223_v33 = vsel %vm1998_vm11, %v76_v20, -1e+30  ;;  %v77_v36 = vld [vmem:[%s3008_s1 + $0x50] sm:$0xff] }
  0xb1   :  { %v171_v42 = vsel %vm143_vm9, %v2223_v33, -inf  ;;  %v2232_v44 = vsel %vm1971_vm10, %v77_v36, -1e+30 }
  0xb4   :  { %229 = vmax.xlane.f32.xlu0 %v228_v45  ;;  %160 = vmax.xlane.f32.xlu1 %v159_v48  ;;  %v78_v45 = vld [vmem:[%s3008_s1 + $0x58] sm:$0xff]  ;;  %v174_v48 = vsel %vm143_vm9, %v2232_v44, -inf }
  0xb5   :  { %v2241_v51 = vsel %vm1998_vm11, %v78_v45, -1e+30 }
  0xb8   :  { %232 = vmax.xlane.f32.xlu0 %v231_v55  ;;  %163 = vmax.xlane.f32.xlu1 %v162_v56  ;;  %v177_v55 = vsel %vm143_vm9, %v2241_v51, -inf  ;;  %v2250_v56 = vsel %vm1971_vm10, %v79_v54, -1e+30 }
  0xb9   :  { %v180_v62 = vsel %vm143_vm9, %v2250_v56, -inf }
  0xbc   :  { %235 = vmax.xlane.f32.xlu0 %v234_v63  ;;  %166 = vmax.xlane.f32.xlu1 %v165_v8  ;;  %v2259_v63 = vsel %vm1998_vm11, %v80_v61, -1e+30  ;;  %v81_v8 = vld [vmem:[%s3008_s1 + $0x70] sm:$0xff] }
  0xbd   :  { %v183_v20 = vsel %vm143_vm9, %v2259_v63, -inf }
  0xc0   :  { %238 = vmax.xlane.f32.xlu0 %v237_v29  ;;  %169 = vmax.xlane.f32.xlu1 %v168_v32  ;;  %v2268_v29 = vsel %vm1971_vm10, %v81_v8, -1e+30  ;;  %v82_v32 = vld [vmem:[%s3008_s1 + $0x78] sm:$0xff] }
  0xc1   :  { %v186_v36 = vsel %vm143_vm9, %v2268_v29, -inf }
  0xc4   :  { %172 = vmax.xlane.f32.xlu1 %v171_v42  ;;  %v2277_v42 = vsel %vm1998_vm11, %v82_v32, -1e+30 }
  0xc5   :  { %v189_v45 = vsel %vm143_vm9, %v2277_v42, -inf }
  0xc8   :  { %175 = vmax.xlane.f32.xlu1 %v174_v48 }
  0xcc   :  { %178 = vmax.xlane.f32.xlu1 %v177_v55 }
  0xd0   :  { %181 = vmax.xlane.f32.xlu1 %v180_v62 }
  0xd4   :  { %184 = vmax.xlane.f32.xlu1 %v183_v20 }
  0xd8   :  { %187 = vmax.xlane.f32.xlu1 %v186_v36 }
  0xdc   :  { %190 = vmax.xlane.f32.xlu1 %v189_v45 }
 0x11d   :  { %v146_v48 = vpop.xlane.xlu1 %145 }
 0x11e   :  { %v2281_v21 = vmax.f32 %v146_v48, -1.0 }
 0x120   :  { %v272_v54 = vsub.f32 %v1983_v23, %v2281_v21 }
 0x121   :  { %v149_v55 = vpop.xlane.xlu0 %148  ;;  %v194_v61 = vpop.xlane.xlu1 %193 }
 0x122   :  { %v304_v62 = vmul.f32 1.442695, %v272_v54  ;;  %v2285_v8 = vmax.f32 %v149_v55, -1.0  ;;  %v2287_v20 = vmax.f32 %v194_v61, -1.0 }
 0x124   :  { %1543 = vpow2.f32 %v304_v62  ;;  %v273_v28 = vsub.f32 %v2013_v31, %v2285_v8  ;;  %v288_v32 = vsub.f32 %v1995_v27, %v2287_v20 }
 0x125   :  { %v197_v36 = vpop.xlane.xlu1 %196  ;;  %v209_v6 = vpop.xlane.xlu0 %208 }
 0x126   :  { %v306_v45 = vmul.f32 1.442695, %v273_v28  ;;  %v336_v48 = vmul.f32 1.442695, %v288_v32  ;;  %v2293_v4 = vmax.f32 %v197_v36, -1.0 }
 0x128   :  { %1545 = vpow2.f32 %v306_v45  ;;  %v289_v23 = vsub.f32 %v2026_v35, %v2293_v4 }
 0x129   :  { %v152_v54 = vpop.xlane.xlu1 %151  ;;  %1547 = vpow2.f32 %v336_v48  ;;  %v212_v62 = vpop.xlane.xlu0 %211 }
 0x12a   :  { %v2297_v55 = vmax.f32 %v152_v54, -1.0  ;;  %v338_v61 = vmul.f32 1.442695, %v289_v23 }
 0x12c   :  { %v274_v31 = vsub.f32 %v2047_v41, %v2297_v55  ;;  %1549 = vpow2.f32 %v338_v61 }
 0x12d   :  { %v200_v27 = vpop.xlane.xlu1 %199  ;;  %v215_v54 = vpop.xlane.xlu0 %214 }
 0x12e   :  { %v1544_v3 = vpop.eup %1543  ;;  %v308_v28 = vmul.f32 1.442695, %v274_v31  ;;  %v2301_v32 = vmax.f32 %v200_v27, -1.0 }
 0x12f   :  { %v368_v36 = vsel %vm143_vm9, %v1544_v3, 0.0 }
 0x130   :  { %v290_v35 = vsub.f32 %v2068_v47, %v2301_v32  ;;  %369 = vadd.xlane.f32.xlu1 %v368_v36  ;;  %1551 = vpow2.f32 %v308_v28 }
 0x131   :  { %v155_v45 = vpop.xlane.xlu1 %154  ;;  %v218_v36 = vpop.xlane.xlu0 %217 }
 0x132   :  { %v1546_v48 = vpop.eup %1545  ;;  %v2306_v23 = vmax.f32 %v155_v45, -1.0  ;;  %v340_v16 = vmul.f32 1.442695, %v290_v35 }
 0x133   :  { %v1548_v41 = vpop.eup %1547  ;;  %v371_v31 = vsel %vm143_vm9, %v1546_v48, 0.0 }
 0x134   :  { %v275_v61 = vsub.f32 %v2086_v53, %v2306_v23  ;;  %372 = vadd.xlane.f32.xlu1 %v371_v31  ;;  %v416_v3 = vsel %vm143_vm9, %v1548_v41, 0.0  ;;  %1553 = vpow2.f32 %v340_v16  ;;  %v2319_v41 = vmax.f32 %v209_v6, -1.0 }
 0x135   :  { %v203_v27 = vpop.xlane.xlu1 %202  ;;  %417 = vadd.xlane.f32.xlu0 %v416_v3 }
 0x136   :  { %v310_v47 = vmul.f32 1.442695, %v275_v61  ;;  %v2312_v14 = vmax.f32 %v203_v27, -1.0  ;;  %v1550_v45 = vpop.eup %1549  ;;  %v221_v61 = vpop.xlane.xlu0 %220 }
 0x137   :  { %v419_v35 = vsel %vm143_vm9, %v1550_v45, 0.0  ;;  %v2328_v45 = vmax.f32 %v212_v62, -1.0 }
 0x138   :  { %v291_v28 = vsub.f32 %v2104_v59, %v2312_v14  ;;  %1555 = vpow2.f32 %v310_v47 }
 0x139   :  { %v158_v1 = vpop.xlane.xlu1 %157  ;;  %420 = vadd.xlane.f32.xlu0 %v419_v35 }
 0x13a   :  { %v342_v53 = vmul.f32 1.442695, %v291_v28  ;;  %v2317_v48 = vmax.f32 %v158_v1, -1.0  ;;  %v1552_v31 = vpop.eup %1551  ;;  %v293_v1 = vsub.f32 %v2021_v34, %v2319_v41  ;;  %v2337_v34 = vmax.f32 %v215_v54, -1.0 }
 0x13b   :  { %v374_v3 = vsel %vm143_vm9, %v1552_v31, 0.0 }
 0x13c   :  { %v276_v27 = vsub.f32 %v2122_v7, %v2317_v48  ;;  %1557 = vpow2.f32 %v342_v53  ;;  %375 = vadd.xlane.f32.xlu1 %v374_v3  ;;  %v224_v7 = vpop.xlane.xlu0 %223  ;;  %v294_v3 = vsub.f32 %v2042_v40, %v2328_v45  ;;  %v2346_v40 = vmax.f32 %v218_v36, -1.0 }
 0x13d   :  { %v206_v16 = vpop.xlane.xlu1 %205 }
 0x13e   :  { %v312_v59 = vmul.f32 1.442695, %v276_v27  ;;  %v2324_v0 = vmax.f32 %v206_v16, -1.0  ;;  %v1554_v47 = vpop.eup %1553  ;;  %v346_v27 = vmul.f32 1.442695, %v293_v1  ;;  %v295_v1 = vsub.f32 %v2063_v46, %v2337_v34 }
 0x13f   :  { %v422_v35 = vsel %vm143_vm9, %v1554_v47, 0.0  ;;  %v296_v46 = vsub.f32 %v2082_v52, %v2346_v40 }
 0x140   :  { %v292_v28 = vsub.f32 %v2140_v26, %v2324_v0  ;;  %1559 = vpow2.f32 %v312_v59  ;;  %423 = vadd.xlane.f32.xlu0 %v422_v35  ;;  %v227_v35 = vpop.xlane.xlu0 %226 }
 0x141   :  { %v161_v6 = vpop.xlane.xlu1 %160 }
 0x142   :  { %v344_v53 = vmul.f32 1.442695, %v292_v28  ;;  %v2333_v31 = vmax.f32 %v161_v6, -1.0  ;;  %v1556_v16 = vpop.eup %1555  ;;  %v348_v28 = vmul.f32 1.442695, %v294_v3 }
 0x143   :  { %v377_v26 = vsel %vm143_vm9, %v1556_v16, 0.0  ;;  %v350_v3 = vmul.f32 1.442695, %v295_v1  ;;  %v352_v1 = vmul.f32 1.442695, %v296_v46 }
 0x144   :  { %v277_v13 = vsub.f32 %v2158_v39, %v2333_v31  ;;  %1561 = vpow2.f32 %v344_v53  ;;  %378 = vadd.xlane.f32.xlu1 %v377_v26 }
 0x145   :  { %v164_v62 = vpop.xlane.xlu1 %163  ;;  %1563 = vpow2.f32 %v346_v27 }
 0x146   :  { %v314_v59 = vmul.f32 1.442695, %v277_v13  ;;  %v2342_v47 = vmax.f32 %v164_v62, -1.0  ;;  %v1558_v6 = vpop.eup %1557  ;;  %v2351_v13 = vmax.f32 %v221_v61, -1.0 }
 0x147   :  { %v425_v16 = vsel %vm143_vm9, %v1558_v6, 0.0 }
 0x148   :  { %v278_v39 = vsub.f32 %v2176_v50, %v2342_v47  ;;  %1565 = vpow2.f32 %v314_v59  ;;  %426 = vadd.xlane.f32.xlu0 %v425_v16  ;;  %v297_v61 = vsub.f32 %v2100_v58, %v2351_v13  ;;  %v230_v59 = vpop.xlane.xlu0 %229 }
 0x149   :  { %v167_v54 = vpop.xlane.xlu1 %166  ;;  %1567 = vpow2.f32 %v348_v28 }
 0x14a   :  { %v316_v53 = vmul.f32 1.442695, %v278_v39  ;;  %v2353_v62 = vmax.f32 %v167_v54, -1.0  ;;  %v1560_v27 = vpop.eup %1559  ;;  %v2364_v39 = vmax.f32 %v224_v7, -1.0  ;;  %v354_v58 = vmul.f32 1.442695, %v297_v61 }
 0x14b   :  { %v380_v50 = vsel %vm143_vm9, %v1560_v27, 0.0 }
 0x14c   :  { %v279_v26 = vsub.f32 %v2194_v60, %v2353_v62  ;;  %1569 = vpow2.f32 %v316_v53  ;;  %381 = vadd.xlane.f32.xlu1 %v380_v50  ;;  %v298_v7 = vsub.f32 %v2118_v2, %v2364_v39  ;;  %v233_v46 = vpop.xlane.xlu0 %232 }
 0x14d   :  { %v170_v36 = vpop.xlane.xlu1 %169  ;;  %1571 = vpow2.f32 %v350_v3 }
 0x14e   :  { %v318_v6 = vmul.f32 1.442695, %v279_v26  ;;  %v2362_v54 = vmax.f32 %v170_v36, -1.0  ;;  %v1562_v28 = vpop.eup %1561  ;;  %v2371_v26 = vmax.f32 %v227_v35, -1.0 }
 0x14f   :  { %v428_v16 = vsel %vm143_vm9, %v1562_v28, 0.0  ;;  %v1564_v53 = vpop.eup %1563 }
 0x150   :  { %v280_v60 = vsub.f32 %v2212_v18, %v2362_v54  ;;  %1573 = vpow2.f32 %v318_v6  ;;  %429 = vadd.xlane.f32.xlu0 %v428_v16  ;;  %v431_v28 = vsel %vm143_vm9, %v1564_v53, 0.0  ;;  %v299_v2 = vsub.f32 %v2136_v24, %v2371_v26 }
 0x151   :  { %v173_v52 = vpop.xlane.xlu1 %172  ;;  %1575 = vpow2.f32 %v352_v1  ;;  %v2385_v16 = vmax.f32 %v230_v59, -1.0 }
 0x152   :  { %v2369_v27 = vmax.f32 %v173_v52, -1.0  ;;  %v320_v36 = vmul.f32 1.442695, %v280_v60  ;;  %v1566_v50 = vpop.eup %1565  ;;  %v356_v60 = vmul.f32 1.442695, %v298_v7 }
 0x153   :  { %v383_v6 = vsel %vm143_vm9, %v1566_v50, 0.0  ;;  %v1568_v61 = vpop.eup %1567  ;;  %v358_v24 = vmul.f32 1.442695, %v299_v2  ;;  %v300_v59 = vsub.f32 %v2154_v38, %v2385_v16 }
 0x154   :  { %v281_v3 = vsub.f32 %v2223_v33, %v2369_v27  ;;  %1577 = vpow2.f32 %v320_v36  ;;  %432 = vadd.xlane.f32.xlu0 %v431_v28  ;;  %384 = vadd.xlane.f32.xlu1 %v383_v6  ;;  %v2391_v28 = vmax.f32 %v233_v46, -1.0 }
 0x155   :  { %v176_v18 = vpop.xlane.xlu1 %175  ;;  %1579 = vpow2.f32 %v354_v58 }
 0x156   :  { %v2379_v52 = vmax.f32 %v176_v18, -1.0  ;;  %v322_v35 = vmul.f32 1.442695, %v281_v3  ;;  %v1570_v1 = vpop.eup %1569  ;;  %v434_v18 = vsel %vm143_vm9, %v1568_v61, 0.0 }
 0x157   :  { %v386_v36 = vsel %vm143_vm9, %v1570_v1, 0.0  ;;  %v1572_v3 = vpop.eup %1571 }
 0x158   :  { %v282_v33 = vsub.f32 %v2232_v44, %v2379_v52  ;;  %1581 = vpow2.f32 %v322_v35  ;;  %435 = vadd.xlane.f32.xlu0 %v434_v18  ;;  %387 = vadd.xlane.f32.xlu1 %v386_v36  ;;  %v236_v44 = vpop.xlane.xlu0 %235  ;;  %v437_v35 = vsel %vm143_vm9, %v1572_v3, 0.0  ;;  %v720_v36 = vld [vmem:[%s3009_s2] sm:$0xff]  ;;  %s2754_s2 = scalar_select %p1177_p1, %s3007_s0, 16 }
 0x159   :  { %v179_v53 = vpop.xlane.xlu1 %178  ;;  %1439 = vmatprep.subr.mxu0 %v720_v36  ;;  %1489 = vmatprep.subr.mxu1 %v720_v36 }
 0x15a   :  { %v324_v50 = vmul.f32 1.442695, %v282_v33  ;;  %v2389_v58 = vmax.f32 %v179_v53, -1.0  ;;  %v1574_v7 = vpop.eup %1573  ;;  %1440 = vmatpush3.msra.mxu0 %v720_v36  ;;  %1490 = vmatpush3.msra.mxu1 %v720_v36 }
 0x15b   :  { %v389_v33 = vsel %vm143_vm9, %v1574_v7, 0.0  ;;  %v1576_v2 = vpop.eup %1575 }
 0x15c   :  { %1583 = vpow2.f32 %v324_v50  ;;  %v283_v6 = vsub.f32 %v2241_v51, %v2389_v58  ;;  %438 = vadd.xlane.f32.xlu0 %v437_v35  ;;  %390 = vadd.xlane.f32.xlu1 %v389_v33  ;;  %v360_v51 = vmul.f32 1.442695, %v300_v59  ;;  %v2405_v50 = vmax.f32 %v236_v44, -1.0  ;;  %v239_v7 = vpop.xlane.xlu0 %238 }
 0x15d   :  { %1585 = vpow2.f32 %v356_v60  ;;  %v182_v61 = vpop.xlane.xlu1 %181  ;;  %v301_v60 = vsub.f32 %v2172_v49, %v2391_v28  ;;  %v2417_v33 = vmax.f32 %v239_v7, -1.0 }
 0x15e   :  { %v2399_v1 = vmax.f32 %v182_v61, -1.0  ;;  %v326_v46 = vmul.f32 1.442695, %v283_v6  ;;  %1587 = vpow2.f32 %v358_v24  ;;  %v1578_v53 = vpop.eup %1577  ;;  %v440_v24 = vsel %vm143_vm9, %v1576_v2, 0.0 }
 0x15f   :  { %v1580_v3 = vpop.eup %1579  ;;  %v392_v49 = vsel %vm143_vm9, %v1578_v53, 0.0  ;;  %v362_v59 = vmul.f32 1.442695, %v301_v60  ;;  %v302_v35 = vsub.f32 %v2190_v57, %v2405_v50 }
 0x160   :  { %v284_v38 = vsub.f32 %v2250_v56, %v2399_v1  ;;  %1589 = vpow2.f32 %v326_v46  ;;  %441 = vadd.xlane.f32.xlu0 %v440_v24  ;;  %393 = vadd.xlane.f32.xlu1 %v392_v49  ;;  %v443_v53 = vsel %vm143_vm9, %v1580_v3, 0.0 }
 0x161   :  { %v185_v18 = vpop.xlane.xlu1 %184  ;;  %v364_v36 = vmul.f32 1.442695, %v302_v35 }
 0x162   :  { %v328_v6 = vmul.f32 1.442695, %v284_v38  ;;  %v1582_v56 = vpop.eup %1581  ;;  %v2412_v44 = vmax.f32 %v185_v18, -1.0 }
 0x163   :  { %v395_v61 = vsel %vm143_vm9, %v1582_v56, 0.0 }
 0x164   :  { %1591 = vpow2.f32 %v328_v6  ;;  %v285_v2 = vsub.f32 %v2259_v63, %v2412_v44  ;;  %444 = vadd.xlane.f32.xlu0 %v443_v53  ;;  %396 = vadd.xlane.f32.xlu1 %v395_v61  ;;  %v303_v63 = vsub.f32 %v2208_v9, %v2417_v33 }
 0x165   :  { %1593 = vpow2.f32 %v360_v51  ;;  %v188_v46 = vpop.xlane.xlu1 %187 }
 0x166   :  { %v1584_v38 = vpop.eup %1583  ;;  %v2422_v18 = vmax.f32 %v188_v46, -1.0  ;;  %v330_v6 = vmul.f32 1.442695, %v285_v2  ;;  %1595 = vpow2.f32 %v362_v59  ;;  %v366_v61 = vmul.f32 1.442695, %v303_v63 }
 0x167   :  { %v1586_v60 = vpop.eup %1585  ;;  %v398_v57 = vsel %vm143_vm9, %v1584_v38, 0.0 }
 0x168   :  { %v286_v51 = vsub.f32 %v2268_v29, %v2422_v18  ;;  %1597 = vpow2.f32 %v330_v6  ;;  %v1588_v24 = vpop.eup %1587  ;;  %v446_v49 = vsel %vm143_vm9, %v1586_v60, 0.0  ;;  %399 = vadd.xlane.f32.xlu1 %v398_v57 }
 0x169   :  { %v191_v7 = vpop.xlane.xlu1 %190  ;;  %447 = vadd.xlane.f32.xlu0 %v446_v49  ;;  %v449_v46 = vsel %vm143_vm9, %v1588_v24, 0.0 }
 0x16a   :  { %v332_v3 = vmul.f32 1.442695, %v286_v51  ;;  %v2430_v56 = vmax.f32 %v191_v7, -1.0  ;;  %v1590_v2 = vpop.eup %1589 }
 0x16b   :  { %v401_v59 = vsel %vm143_vm9, %v1590_v2, 0.0 }
 0x16c   :  { %1599 = vpow2.f32 %v332_v3  ;;  %v287_v29 = vsub.f32 %v2277_v42, %v2430_v56  ;;  %402 = vadd.xlane.f32.xlu1 %v401_v59  ;;  %v464_v59 = vsub.f32 -1.0, %v2281_v21 }
 0x16d   :  { %1601 = vpow2.f32 %v364_v36  ;;  %450 = vadd.xlane.f32.xlu0 %v449_v46 }
 0x16e   :  { %v1592_v9 = vpop.eup %1591  ;;  %v334_v35 = vmul.f32 1.442695, %v287_v29 }
 0x16f   :  { %v1594_v38 = vpop.eup %1593  ;;  %v404_v53 = vsel %vm143_vm9, %v1592_v9, 0.0  ;;  %v465_v9 = vsub.f32 -1.0, %v2285_v8 }
 0x170   :  { %1603 = vpow2.f32 %v334_v35  ;;  %v1596_v60 = vpop.eup %1595  ;;  %v452_v6 = vsel %vm143_vm9, %v1594_v38, 0.0  ;;  %405 = vadd.xlane.f32.xlu1 %v404_v53  ;;  %v480_v35 = vsub.f32 -1.0, %v2287_v20  ;;  %v481_v53 = vsub.f32 -1.0, %v2293_v4 }
 0x171   :  { %1605 = vpow2.f32 %v366_v61  ;;  %453 = vadd.xlane.f32.xlu0 %v452_v6  ;;  %v455_v36 = vsel %vm143_vm9, %v1596_v60, 0.0  ;;  %v496_v61 = vmul.f32 1.442695, %v464_v59  ;;  %v498_v46 = vmul.f32 1.442695, %v465_v9 }
 0x172   :  { %v1598_v51 = vpop.eup %1597  ;;  %v528_v38 = vmul.f32 1.442695, %v480_v35  ;;  %v530_v60 = vmul.f32 1.442695, %v481_v53  ;;  %v466_v6 = vsub.f32 -1.0, %v2297_v55  ;;  %v483_v35 = vsub.f32 -1.0, %v2312_v14 }
 0x173   :  { %v407_v42 = vsel %vm143_vm9, %v1598_v51, 0.0  ;;  %1607 = vpow2.f32 %v496_v61  ;;  %v482_v51 = vsub.f32 -1.0, %v2301_v32 }
 0x174   :  { %408 = vadd.xlane.f32.xlu1 %v407_v42  ;;  %1609 = vpow2.f32 %v498_v46 }
 0x175   :  { %456 = vadd.xlane.f32.xlu0 %v455_v36  ;;  %1611 = vpow2.f32 %v528_v38  ;;  %v485_v38 = vsub.f32 -1.0, %v2319_v41 }
 0x176   :  { %v1600_v57 = vpop.eup %1599  ;;  %1613 = vpow2.f32 %v530_v60  ;;  %v486_v60 = vsub.f32 -1.0, %v2328_v45 }
 0x177   :  { %v1602_v63 = vpop.eup %1601  ;;  %v410_v7 = vsel %vm143_vm9, %v1600_v57, 0.0  ;;  %v500_v57 = vmul.f32 1.442695, %v466_v6 }
 0x178   :  { %v458_v3 = vsel %vm143_vm9, %v1602_v63, 0.0  ;;  %411 = vadd.xlane.f32.xlu1 %v410_v7  ;;  %v532_v7 = vmul.f32 1.442695, %v482_v51  ;;  %v534_v51 = vmul.f32 1.442695, %v483_v35  ;;  %v487_v35 = vsub.f32 -1.0, %v2337_v34 }
 0x179   :  { %459 = vadd.xlane.f32.xlu0 %v458_v3 }
 0x17a   :  { %v1604_v24 = vpop.eup %1603 }
 0x17b   :  { %v1606_v49 = vpop.eup %1605  ;;  %v413_v2 = vsel %vm143_vm9, %v1604_v24, 0.0  ;;  %v467_v24 = vsub.f32 -1.0, %v2306_v23 }
 0x17c   :  { %v461_v29 = vsel %vm143_vm9, %v1606_v49, 0.0  ;;  %414 = vadd.xlane.f32.xlu1 %v413_v2 }
 0x17d   :  { %462 = vadd.xlane.f32.xlu0 %v461_v29  ;;  %v1608_v42 = vpop.eup %1607  ;;  %v502_v9 = vmul.f32 1.442695, %v467_v24 }
 0x17e   :  { %v1610_v3 = vpop.eup %1609 }
 0x17f   :  { %v1612_v2 = vpop.eup %1611 }
 0x180   :  { %v1614_v46 = vpop.eup %1613 }
 0x1bd   :  { %v370_v36 = vpop.xlane.xlu1 %369 }
 0x1be   :  { %v560_v63 = vadd.f32 %v1608_v42, %v370_v36  ;;  %v468_v42 = vsub.f32 -1.0, %v2317_v48 }
 0x1c0   :  { %1615 = vlog2.f32 %v560_v63  ;;  %v538_v63 = vmul.f32 1.442695, %v485_v38 }
 0x1c1   :  { %1617 = vpow2.f32 %v500_v57  ;;  %v373_v49 = vpop.xlane.xlu1 %372 }
 0x1c2   :  { %v418_v29 = vpop.xlane.xlu0 %417  ;;  %v561_v59 = vadd.f32 %v1610_v3, %v373_v49  ;;  %1619 = vpow2.f32 %v532_v7  ;;  %v540_v3 = vmul.f32 1.442695, %v486_v60  ;;  %v484_v49 = vsub.f32 -1.0, %v2324_v0 }
 0x1c3   :  { %v576_v61 = vadd.f32 %v1612_v2, %v418_v29  ;;  %v504_v29 = vmul.f32 1.442695, %v468_v42 }
 0x1c4   :  { %1621 = vlog2.f32 %v561_v59 }
 0x1c5   :  { %1623 = vlog2.f32 %v576_v61 }
 0x1c6   :  { %v421_v53 = vpop.xlane.xlu0 %420  ;;  %1625 = vpow2.f32 %v502_v9 }
 0x1c7   :  { %v577_v6 = vadd.f32 %v1614_v46, %v421_v53  ;;  %v488_v46 = vsub.f32 -1.0, %v2346_v40 }
 0x1c9   :  { %1627 = vlog2.f32 %v577_v6  ;;  %v376_v24 = vpop.xlane.xlu1 %375  ;;  %v536_v6 = vmul.f32 1.442695, %v484_v49 }
 0x1ca   :  { %v1616_v57 = vpop.eup %1615  ;;  %1629 = vpow2.f32 %v534_v51 }
 0x1cb   :  { %v1618_v36 = vpop.eup %1617  ;;  %v593_v7 = vmul.f32 0.6931472, %v1616_v57 }
 0x1cc   :  { %v562_v2 = vadd.f32 %v1618_v36, %v376_v24  ;;  %v1620_v61 = vpop.eup %1619  ;;  %v544_v24 = vmul.f32 1.442695, %v488_v46 }
 0x1cd   :  { %v2457_v59 = vadd.f32 %v593_v7, %v2281_v21  ;;  %v424_v38 = vpop.xlane.xlu0 %423  ;;  %v469_v21 = vsub.f32 -1.0, %v2333_v31  ;;  %v542_v7 = vmul.f32 1.442695, %v487_v35 }
 0x1ce   :  { %1631 = vlog2.f32 %v562_v2  ;;  %v1622_v9 = vpop.eup %1621  ;;  %v578_v42 = vadd.f32 %v1620_v61, %v424_v38  ;;  %v470_v38 = vsub.f32 -1.0, %v2342_v47 }
 0x1cf   :  { %1633 = vpow2.f32 %v538_v63  ;;  %v688_v53 = vsub.f32 %v1968_v19, %v2457_v59  ;;  %v1624_v60 = vpop.eup %1623  ;;  %v595_v51 = vmul.f32 0.6931472, %v1622_v9  ;;  %v489_v19 = vsub.f32 -1.0, %v2351_v13 }
 0x1d0   :  { %1635 = vpow2.f32 %v540_v3  ;;  %v625_v57 = vmul.f32 0.6931472, %v1624_v60  ;;  %v1626_v63 = vpop.eup %1625  ;;  %v491_v60 = vsub.f32 -1.0, %v2371_v26 }
 0x1d1   :  { %1637 = vpow2.f32 %v504_v29  ;;  %1441 = vmatprep.mubr.msk.f32.mxu0 %vm143_vm9, %v688_v53  ;;  %v2466_v36 = vadd.f32 %v595_v51, %v2285_v8  ;;  %v379_v2 = vpop.xlane.xlu1 %378  ;;  %v490_v29 = vsub.f32 -1.0, %v2364_v39  ;;  %v506_v8 = vmul.f32 1.442695, %v469_v21 }
 0x1d2   :  { %1639 = vlog2.f32 %v578_v42  ;;  %v2470_v3 = vadd.f32 %v625_v57, %v2287_v20  ;;  %v563_v61 = vadd.f32 %v1626_v63, %v379_v2  ;;  %v546_v46 = vmul.f32 1.442695, %v489_v19 }
 0x1d3   :  { %v1628_v49 = vpop.eup %1627  ;;  %1641 = vpow2.f32 %v536_v6  ;;  %v689_v9 = vsub.f32 %v1990_v25, %v2466_v36  ;;  %v548_v42 = vmul.f32 1.442695, %v490_v29  ;;  %v471_v21 = vsub.f32 -1.0, %v2353_v62 }
 0x1d4   :  { %v627_v53 = vmul.f32 0.6931472, %v1628_v49  ;;  %v704_v35 = vsub.f32 %v1978_v22, %v2470_v3  ;;  %1643 = vlog2.f32 %v563_v61  ;;  %v1630_v20 = vpop.eup %1629  ;;  %v508_v63 = vmul.f32 1.442695, %v470_v38 }
 0x1d5   :  { %1442 = vmatmul.mubr.msk.f32.vlgmr.msra.gmra.mrb[0].mxu0 %vm143_vm9, %v689_v9  ;;  %1645 = vpow2.f32 %v542_v7  ;;  %v427_v25 = vpop.xlane.xlu0 %426  ;;  %v550_v49 = vmul.f32 1.442695, %v491_v60  ;;  %v492_v61 = vsub.f32 -1.0, %v2385_v16 }
 0x1d6   :  { %v2481_v6 = vadd.f32 %v627_v53, %v2293_v4  ;;  %1465 = vmatprep.mubr.msk.f32.mxu1 %vm143_vm9, %v704_v35  ;;  %1647 = vpow2.f32 %v544_v24  ;;  %v579_v22 = vadd.f32 %v1630_v20, %v427_v25 }
 0x1d7   :  { %1649 = vpow2.f32 %v506_v8  ;;  %v510_v8 = vmul.f32 1.442695, %v471_v21 }
 0x1d8   :  { %v1632_v51 = vpop.eup %1631  ;;  %v705_v7 = vsub.f32 %v2008_v30, %v2481_v6  ;;  %1651 = vlog2.f32 %v579_v22  ;;  %v472_v30 = vsub.f32 -1.0, %v2362_v54 }
 0x1d9   :  { %v1634_v57 = vpop.eup %1633  ;;  %v597_v2 = vmul.f32 0.6931472, %v1632_v51  ;;  %1653 = vpow2.f32 %v546_v46  ;;  %v382_v29 = vpop.xlane.xlu1 %381  ;;  %v552_v46 = vmul.f32 1.442695, %v492_v61  ;;  %v493_v51 = vsub.f32 -1.0, %v2391_v28 }
 0x1da   :  { %v2487_v19 = vpop.eup %1635  ;;  %1466 = vmatmul.mubr.msk.f32.vlgmr.msra.gmra.mrb[0].mxu1 %vm143_vm9, %v705_v7  ;;  %1655 = vpow2.f32 %v548_v42  ;;  %v512_v22 = vmul.f32 1.442695, %v472_v30 }
 0x1db   :  { %v1638_v4 = vpop.eup %1637  ;;  %v2491_v24 = vadd.f32 %v597_v2, %v2297_v55  ;;  %1657 = vpow2.f32 %v508_v63  ;;  %v473_v63 = vsub.f32 -1.0, %v2369_v27 }
 0x1dc   :  { %v1640_v9 = vpop.eup %1639  ;;  %v564_v38 = vadd.f32 %v1638_v4, %v382_v29 }
 0x1dd   :  { %v629_v53 = vmul.f32 0.6931472, %v1640_v9  ;;  %v690_v35 = vsub.f32 %v2034_v37, %v2491_v24  ;;  %v1642_v20 = vpop.eup %1641  ;;  %v430_v60 = vpop.xlane.xlu0 %429  ;;  %v554_v9 = vmul.f32 1.442695, %v493_v51 }
 0x1de   :  { %1659 = vlog2.f32 %v564_v38  ;;  %v1644_v25 = vpop.eup %1643  ;;  %v580_v42 = vadd.f32 %v1642_v20, %v430_v60 }
 0x1df   :  { %1661 = vpow2.f32 %v550_v49  ;;  %v2498_v55 = vadd.f32 %v629_v53, %v2301_v32  ;;  %1444 = vmatprep.mubr.msk.f32.mxu0 %vm143_vm9, %v690_v35  ;;  %v1646_v21 = vpop.eup %1645  ;;  %v599_v37 = vmul.f32 0.6931472, %v1644_v25  ;;  %v494_v25 = vsub.f32 -1.0, %v2405_v50 }
 0x1e0   :  { %1663 = vpow2.f32 %v510_v8  ;;  %v2505_v7 = vpop.eup %1647  ;;  %v474_v8 = vsub.f32 -1.0, %v2379_v52 }
 0x1e1   :  { %v706_v2 = vsub.f32 %v2055_v43, %v2498_v55  ;;  %1665 = vlog2.f32 %v580_v42  ;;  %v1650_v32 = vpop.eup %1649  ;;  %v2508_v4 = vadd.f32 %v599_v37, %v2306_v23  ;;  %v433_v49 = vpop.xlane.xlu0 %432  ;;  %v514_v43 = vmul.f32 1.442695, %v473_v63  ;;  %v1735_v23 = vld [vmem:[%s3008_s1 + $0x18] sm:$0xff] }
 0x1e2   :  { %1667 = vpow2.f32 %v552_v46  ;;  %v385_v61 = vpop.xlane.xlu1 %384  ;;  %v1652_v29 = vpop.eup %1651  ;;  %v581_v38 = vadd.f32 %v1634_v57, %v433_v49  ;;  %v516_v63 = vmul.f32 1.442695, %v474_v8  ;;  %v475_v49 = vsub.f32 -1.0, %v2389_v58 }
 0x1e3   :  { %1468 = vmatprep.mubr.msk.f32.mxu1 %vm143_vm9, %v706_v2  ;;  %v565_v30 = vadd.f32 %v1650_v32, %v385_v61  ;;  %v2512_v53 = vpop.eup %1653  ;;  %1669 = vpow2.f32 %v512_v22  ;;  %v631_v35 = vmul.f32 0.6931472, %v1652_v29  ;;  %v691_v20 = vsub.f32 %v1735_v23, %v2508_v4 }
 0x1e4   :  { %v2518_v46 = vpop.eup %1655  ;;  %1671 = vlog2.f32 %v581_v38 }
 0x1e5   :  { %v1658_v60 = vpop.eup %1657  ;;  %v2522_v57 = vadd.f32 %v631_v35, %v2312_v14  ;;  %1673 = vlog2.f32 %v565_v30  ;;  %v436_v51 = vpop.xlane.xlu0 %435  ;;  %1445 = vmatmul.mubr.msk.f32.gmra.mrb[2].mxu0 %vm143_vm9, %v691_v20  ;;  %v1736_v14 = vld [vmem:[%s3008_s1 + $0x98] sm:$0xff] }
 0x1e6   :  { %v388_v42 = vpop.xlane.xlu1 %387  ;;  %1675 = vpow2.f32 %v554_v9  ;;  %v582_v37 = vadd.f32 %v2487_v19, %v436_v51  ;;  %v476_v51 = vsub.f32 -1.0, %v2399_v1 }
 0x1e7   :  { %v566_v2 = vadd.f32 %v1658_v60, %v388_v42  ;;  %1677 = vpow2.f32 %v514_v43  ;;  %v707_v29 = vsub.f32 %v1736_v14, %v2522_v57  ;;  %v556_v43 = vmul.f32 1.442695, %v494_v25 }
 0x1e8   :  { %v1660_v22 = vpop.eup %1659  ;;  %1679 = vlog2.f32 %v582_v37  ;;  %v518_v60 = vmul.f32 1.442695, %v475_v49  ;;  %v477_v49 = vsub.f32 -1.0, %v2412_v44 }
 0x1e9   :  { %v2526_v32 = vpop.eup %1661  ;;  %v601_v61 = vmul.f32 0.6931472, %v1660_v22  ;;  %1681 = vlog2.f32 %v566_v2  ;;  %1469 = vmatmul.mubr.msk.f32.gmra.mrb[2].mxu1 %vm143_vm9, %v707_v29  ;;  %v439_v19 = vpop.xlane.xlu0 %438 }
 0x1ea   :  { %v1664_v38 = vpop.eup %1663  ;;  %v391_v8 = vpop.xlane.xlu1 %390  ;;  %1683 = vpow2.f32 %v516_v63  ;;  %v583_v35 = vadd.f32 %v1646_v21, %v439_v19 }
 0x1eb   :  { %v2534_v9 = vadd.f32 %v601_v61, %v2317_v48  ;;  %v1666_v30 = vpop.eup %1665  ;;  %v567_v23 = vadd.f32 %v1664_v38, %v391_v8  ;;  %v1737_v48 = vld [vmem:[%s3008_s1 + $0x20] sm:$0xff]  ;;  %v520_v38 = vmul.f32 1.442695, %v476_v51 }
 0x1ec   :  { %v2537_v20 = vpop.eup %1667  ;;  %v633_v42 = vmul.f32 0.6931472, %v1666_v30  ;;  %1685 = vlog2.f32 %v583_v35 }
 0x1ed   :  { %v692_v22 = vsub.f32 %v1737_v48, %v2534_v9  ;;  %v1670_v37 = vpop.eup %1669  ;;  %1687 = vlog2.f32 %v567_v23  ;;  %v442_v21 = vpop.xlane.xlu0 %441 }
 0x1ee   :  { %v2545_v2 = vadd.f32 %v633_v42, %v2324_v0  ;;  %v394_v25 = vpop.xlane.xlu1 %393  ;;  %v1672_v63 = vpop.eup %1671  ;;  %1689 = vpow2.f32 %v556_v43  ;;  %v584_v61 = vadd.f32 %v2505_v7, %v442_v21  ;;  %v1738_v0 = vld [vmem:[%s3008_s1 + $0xa0] sm:$0xff]  ;;  %v522_v42 = vmul.f32 1.442695, %v477_v49 }
 0x1ef   :  { %1447 = vmatprep.mubr.msk.f32.mxu0 %vm143_vm9, %v692_v22  ;;  %v568_v14 = vadd.f32 %v1670_v37, %v394_v25  ;;  %v1674_v29 = vpop.eup %1673  ;;  %1691 = vpow2.f32 %v518_v60  ;;  %v635_v19 = vmul.f32 0.6931472, %v1672_v63  ;;  %v478_v25 = vsub.f32 -1.0, %v2422_v18 }
 0x1f0   :  { %v708_v8 = vsub.f32 %v1738_v0, %v2545_v2  ;;  %v2554_v30 = vpop.eup %1675  ;;  %v603_v35 = vmul.f32 0.6931472, %v1674_v29  ;;  %1693 = vlog2.f32 %v584_v61  ;;  %v495_v49 = vsub.f32 -1.0, %v2417_v33 }
 0x1f1   :  { %v1678_v43 = vpop.eup %1677  ;;  %v2557_v23 = vadd.f32 %v635_v19, %v2319_v41  ;;  %1695 = vlog2.f32 %v568_v14  ;;  %v445_v7 = vpop.xlane.xlu0 %444  ;;  %v1739_v41 = vld [vmem:[%s3008_s1 + $0xa8] sm:$0xff] }
 0x1f2   :  { %1471 = vmatprep.mubr.msk.f32.mxu1 %vm143_vm9, %v708_v8  ;;  %v397_v60 = vpop.xlane.xlu1 %396  ;;  %v1680_v51 = vpop.eup %1679  ;;  %v2561_v48 = vadd.f32 %v603_v35, %v2333_v31  ;;  %v585_v22 = vadd.f32 %v2512_v53, %v445_v7  ;;  %1697 = vpow2.f32 %v520_v38  ;;  %v1740_v31 = vld [vmem:[%s3008_s1 + $0x28] sm:$0xff] }
 0x1f3   :  { %v569_v37 = vadd.f32 %v1678_v43, %v397_v60  ;;  %v1682_v21 = vpop.eup %1681  ;;  %v637_v63 = vmul.f32 0.6931472, %v1680_v51  ;;  %v709_v61 = vsub.f32 %v1739_v41, %v2557_v23  ;;  %v524_v51 = vmul.f32 1.442695, %v478_v25 }
 0x1f4   :  { %v1684_v14 = vpop.eup %1683  ;;  %v605_v29 = vmul.f32 0.6931472, %v1682_v21  ;;  %1699 = vlog2.f32 %v585_v22  ;;  %v693_v53 = vsub.f32 %v1740_v31, %v2561_v48  ;;  %v558_v31 = vmul.f32 1.442695, %v495_v49 }
 0x1f5   :  { %v2575_v38 = vadd.f32 %v637_v63, %v2328_v45  ;;  %1701 = vlog2.f32 %v569_v37  ;;  %1472 = vmatmul.mubr.msk.f32.gmra.mrb[4].mxu1 %vm143_vm9, %v709_v61  ;;  %v479_v45 = vsub.f32 -1.0, %v2430_v56  ;;  %v1741_v37 = vld [vmem:[%s3008_s1 + $0xb0] sm:$0xff] }
 0x1f6   :  { %v448_v19 = vpop.xlane.xlu0 %447  ;;  %v400_v0 = vpop.xlane.xlu1 %399  ;;  %1703 = vpow2.f32 %v522_v42  ;;  %v2579_v35 = vadd.f32 %v605_v29, %v2342_v47  ;;  %1448 = vmatmul.mubr.msk.f32.gmra.mrb[4].mxu0 %vm143_vm9, %v693_v53 }
 0x1f7   :  { %v1686_v8 = vpop.eup %1685  ;;  %v586_v43 = vadd.f32 %v2518_v46, %v448_v19  ;;  %v570_v7 = vadd.f32 %v1684_v14, %v400_v0  ;;  %v710_v21 = vsub.f32 %v1741_v37, %v2575_v38  ;;  %v1742_v46 = vld [vmem:[%s3008_s1 + $0x30] sm:$0xff] }
 0x1f8   :  { %v1688_v60 = vpop.eup %1687  ;;  %v639_v22 = vmul.f32 0.6931472, %v1686_v8  ;;  %v694_v63 = vsub.f32 %v1742_v46, %v2579_v35 }
 0x1f9   :  { %v2588_v42 = vpop.eup %1689  ;;  %v607_v47 = vmul.f32 0.6931472, %v1688_v60  ;;  %1705 = vlog2.f32 %v586_v43  ;;  %1474 = vmatprep.mubr.msk.f32.mxu1 %vm143_vm9, %v710_v21  ;;  %v526_v43 = vmul.f32 1.442695, %v479_v45 }
 0x1fa   :  { %v1692_v25 = vpop.eup %1691  ;;  %v2595_v41 = vadd.f32 %v639_v22, %v2337_v34  ;;  %1707 = vlog2.f32 %v570_v7  ;;  %v451_v61 = vpop.xlane.xlu0 %450  ;;  %1450 = vmatprep.mubr.msk.f32.mxu0 %vm143_vm9, %v694_v63  ;;  %v1743_v7 = vld [vmem:[%s3008_s1 + $0xb8] sm:$0xff] }
 0x1fb   :  { %v403_v14 = vpop.xlane.xlu1 %402  ;;  %v1694_v29 = vpop.eup %1693  ;;  %v2599_v53 = vadd.f32 %v607_v47, %v2353_v62  ;;  %v587_v19 = vadd.f32 %v2526_v32, %v451_v61  ;;  %1709 = vpow2.f32 %v524_v51  ;;  %v1744_v62 = vld [vmem:[%s3008_s1 + $0x38] sm:$0xff] }
 0x1fc   :  { %v571_v0 = vadd.f32 %v1692_v25, %v403_v14  ;;  %v1696_v8 = vpop.eup %1695  ;;  %v641_v34 = vmul.f32 0.6931472, %v1694_v29  ;;  %v711_v60 = vsub.f32 %v1743_v7, %v2595_v41 }
 0x1fd   :  { %v609_v22 = vmul.f32 0.6931472, %v1696_v8  ;;  %1711 = vlog2.f32 %v587_v19  ;;  %v695_v32 = vsub.f32 %v1744_v62, %v2599_v53  ;;  %v1698_v49 = vpop.eup %1697 }
 0x1fe   :  { %v2612_v37 = vadd.f32 %v641_v34, %v2346_v40  ;;  %1713 = vlog2.f32 %v571_v0  ;;  %1475 = vmatmul.mubr.msk.f32.gmra.mrb[6].mxu1 %vm143_vm9, %v711_v60  ;;  %v454_v51 = vpop.xlane.xlu0 %453  ;;  %v1700_v21 = vpop.eup %1699  ;;  %v1745_v40 = vld [vmem:[%s3008_s1 + $0xc0] sm:$0xff] }
 0x1ff   :  { %v406_v45 = vpop.xlane.xlu1 %405  ;;  %1715 = vpow2.f32 %v558_v31  ;;  %v2616_v47 = vadd.f32 %v609_v22, %v2362_v54  ;;  %v588_v46 = vadd.f32 %v2537_v20, %v454_v51  ;;  %1451 = vmatmul.mubr.msk.f32.gmra.mrb[6].mxu0 %vm143_vm9, %v695_v32  ;;  %v1702_v25 = vpop.eup %1701  ;;  %v643_v61 = vmul.f32 0.6931472, %v1700_v21  ;;  %v1746_v54 = vld [vmem:[%s3008_s1 + $0x40] sm:$0xff] }
 0x200   :  { %v572_v63 = vadd.f32 %v1698_v49, %v406_v45  ;;  %1717 = vpow2.f32 %v526_v43  ;;  %v712_v14 = vsub.f32 %v1745_v40, %v2612_v37  ;;  %v1704_v29 = vpop.eup %1703  ;;  %v611_v19 = vmul.f32 0.6931472, %v1702_v25 }
 0x201   :  { %1719 = vlog2.f32 %v588_v46  ;;  %v696_v20 = vsub.f32 %v1746_v54, %v2616_v47  ;;  %v2629_v31 = vadd.f32 %v643_v61, %v2351_v13  ;;  %v1747_v13 = vld [vmem:[%s3008_s1 + $0xc8] sm:$0xff] }
 0x202   :  { %1721 = vlog2.f32 %v572_v63  ;;  %1477 = vmatprep.mubr.msk.f32.mxu1 %vm143_vm9, %v712_v14  ;;  %v457_v0 = vpop.xlane.xlu0 %456  ;;  %v2633_v34 = vadd.f32 %v611_v19, %v2369_v27  ;;  %v1748_v27 = vld [vmem:[%s3008_s1 + $0x48] sm:$0xff] }
 0x203   :  { %v409_v8 = vpop.xlane.xlu1 %408  ;;  %v1706_v43 = vpop.eup %1705  ;;  %v589_v7 = vadd.f32 %v2554_v30, %v457_v0  ;;  %1453 = vmatprep.mubr.msk.f32.mxu0 %vm143_vm9, %v696_v20  ;;  %v713_v32 = vsub.f32 %v1747_v13, %v2629_v31 }
 0x204   :  { %v573_v60 = vadd.f32 %v1704_v29, %v409_v8  ;;  %v1708_v22 = vpop.eup %1707  ;;  %v645_v62 = vmul.f32 0.6931472, %v1706_v43  ;;  %v697_v51 = vsub.f32 %v1748_v27, %v2633_v34 }
 0x205   :  { %v613_v49 = vmul.f32 0.6931472, %v1708_v22  ;;  %1723 = vlog2.f32 %v589_v7  ;;  %v1710_v30 = vpop.eup %1709  ;;  %1478 = vmatmul.mubr.msk.f32.gmra.mrb[8].mxu1 %vm143_vm9, %v713_v32 }
 0x206   :  { %v2646_v45 = vadd.f32 %v645_v62, %v2364_v39  ;;  %1725 = vlog2.f32 %v573_v60  ;;  %v460_v21 = vpop.xlane.xlu0 %459  ;;  %1454 = vmatmul.mubr.msk.f32.gmra.mrb[8].mxu0 %vm143_vm9, %v697_v51  ;;  %v1749_v39 = vld [vmem:[%s3008_s1 + $0xd0] sm:$0xff] }
 0x207   :  { %v412_v46 = vpop.xlane.xlu1 %411  ;;  %v1712_v63 = vpop.eup %1711  ;;  %v2650_v25 = vadd.f32 %v613_v49, %v2379_v52  ;;  %v590_v61 = vadd.f32 %v2588_v42, %v460_v21  ;;  %v1750_v52 = vld [vmem:[%s3008_s1 + $0x50] sm:$0xff] }
 0x208   :  { %v574_v40 = vadd.f32 %v1710_v30, %v412_v46  ;;  %v1714_v14 = vpop.eup %1713  ;;  %v647_v29 = vmul.f32 0.6931472, %v1712_v63  ;;  %v714_v19 = vsub.f32 %v1749_v39, %v2646_v45  ;;  %v1752_v30 = vld [vmem:[%s3008_s1 + $0x58] sm:$0xff] }
 0x209   :  { %v1716_v54 = vpop.eup %1715  ;;  %v615_v20 = vmul.f32 0.6931472, %v1714_v14  ;;  %1727 = vlog2.f32 %v590_v61  ;;  %v698_v42 = vsub.f32 %v1750_v52, %v2650_v25  ;;  %v1753_v14 = vld [vmem:[%s3008_s1 + $0xe0] sm:$0xff] }
 0x20a   :  { %v1718_v0 = vpop.eup %1717  ;;  %v2663_v8 = vadd.f32 %v647_v29, %v2371_v26  ;;  %1729 = vlog2.f32 %v574_v40  ;;  %1480 = vmatprep.mubr.msk.f32.mxu1 %vm143_vm9, %v714_v19  ;;  %v463_v43 = vpop.xlane.xlu0 %462  ;;  %v1751_v26 = vld [vmem:[%s3008_s1 + $0xd8] sm:$0xff] }
 0x20b   :  { %v415_v7 = vpop.xlane.xlu1 %414  ;;  %v1720_v60 = vpop.eup %1719  ;;  %v2667_v22 = vadd.f32 %v615_v20, %v2389_v58  ;;  %v591_v62 = vadd.f32 %v1716_v54, %v463_v43  ;;  %1456 = vmatprep.mubr.msk.f32.mxu0 %vm143_vm9, %v698_v42 }
 0x20c   :  { %v575_v13 = vadd.f32 %v1718_v0, %v415_v7  ;;  %v1722_v32 = vpop.eup %1721  ;;  %v649_v49 = vmul.f32 0.6931472, %v1720_v60  ;;  %v715_v27 = vsub.f32 %v1751_v26, %v2663_v8  ;;  %v1755_v0 = vld [vmem:[%s3008_s1 + $0xe8] sm:$0xff]  ;;  %v1757_v26 = vld [vmem:[%s3008_s1 + $0xf0] sm:$0xff] }
 0x20d   :  { %v617_v51 = vmul.f32 0.6931472, %v1722_v32  ;;  %1731 = vlog2.f32 %v591_v62  ;;  %v699_v58 = vsub.f32 %v1752_v30, %v2667_v22 }
 0x20e   :  { %v2679_v21 = vadd.f32 %v649_v49, %v2385_v16  ;;  %1733 = vlog2.f32 %v575_v13  ;;  %1481 = vmatmul.mubr.msk.f32.gmra.mrb[10].mxu1 %vm143_vm9, %v715_v27  ;;  %v1754_v16 = vld [vmem:[%s3008_s1 + $0x60] sm:$0xff] }
 0x20f   :  { %v1724_v46 = vpop.eup %1723  ;;  %v2683_v63 = vadd.f32 %v617_v51, %v2399_v1  ;;  %1457 = vmatmul.mubr.msk.f32.gmra.mrb[10].mxu0 %vm143_vm9, %v699_v58 }
 0x210   :  { %v1726_v61 = vpop.eup %1725  ;;  %v651_v40 = vmul.f32 0.6931472, %v1724_v46  ;;  %v716_v29 = vsub.f32 %v1753_v14, %v2679_v21  ;;  %v1759_v46 = vld [vmem:[%s3008_s1 + $0xf8] sm:$0xff]  ;;  %v2749_v14 = vld [vmem:[#allocation3 + $0x8] sm:$0xff]  }
 0x211   :  { %v619_v39 = vmul.f32 0.6931472, %v1726_v61  ;;  %v700_v19 = vsub.f32 %v1754_v16, %v2683_v63  ;;  %v1042_v16 = vsub.f32 -1.0, %v2457_v59  ;;  %v1058_v59 = vsub.f32 -1.0, %v2470_v3 }
 0x212   :  { %v2695_v1 = vadd.f32 %v651_v40, %v2391_v28  ;;  %1483 = vmatprep.mubr.msk.f32.mxu1 %vm143_vm9, %v716_v29  ;;  %v1756_v28 = vld [vmem:[%s3008_s1 + $0x68] sm:$0xff]  ;;  %v1760_v40 = vld [vmem:[%s3008_s1 + $0x78] sm:$0xff]  ;;  %v1043_v29 = vsub.f32 -1.0, %v2466_v36  ;;  %v1059_v36 = vsub.f32 -1.0, %v2481_v6  ;;  %v1045_v6 = vsub.f32 -1.0, %v2508_v4 }
 0x213   :  { %v1728_v54 = vpop.eup %1727  ;;  %v2699_v20 = vadd.f32 %v619_v39, %v2412_v44  ;;  %1459 = vmatprep.mubr.msk.f32.mxu0 %vm143_vm9, %v700_v19  ;;  %v1044_v3 = vsub.f32 -1.0, %v2491_v24  ;;  %v1060_v24 = vsub.f32 -1.0, %v2498_v55 }
 0x214   :  { %v1730_v52 = vpop.eup %1729  ;;  %v653_v42 = vmul.f32 0.6931472, %v1728_v54  ;;  %v717_v43 = vsub.f32 %v1755_v0, %v2695_v1 }
 0x215   :  { %v621_v7 = vmul.f32 0.6931472, %v1730_v52  ;;  %v701_v60 = vsub.f32 %v1756_v28, %v2699_v20 }
 0x216   :  { %v2711_v44 = vadd.f32 %v653_v42, %v2405_v50  ;;  %1484 = vmatmul.mubr.msk.f32.gmra.mrb[12].mxu1 %vm143_vm9, %v717_v43  ;;  %v1758_v50 = vld [vmem:[%s3008_s1 + $0x70] sm:$0xff] }
 0x217   :  { %v1732_v62 = vpop.eup %1731  ;;  %v2715_v13 = vadd.f32 %v621_v7, %v2422_v18  ;;  %1460 = vmatmul.mubr.msk.f32.gmra.mrb[12].mxu0 %vm143_vm9, %v701_v60 }
 0x218   :  { %v1734_v32 = vpop.eup %1733  ;;  %v655_v49 = vmul.f32 0.6931472, %v1732_v62  ;;  %v718_v27 = vsub.f32 %v1757_v26, %v2711_v44 }
 0x219   :  { %v623_v51 = vmul.f32 0.6931472, %v1734_v32  ;;  %v702_v30 = vsub.f32 %v1758_v50, %v2715_v13 }
 0x21a   :  { %v2727_v18 = vadd.f32 %v655_v49, %v2417_v33  ;;  %1486 = vmatprep.mubr.msk.f32.mxu1 %vm143_vm9, %v718_v27 }
 0x21b   :  { %v2731_v58 = vadd.f32 %v623_v51, %v2430_v56  ;;  %1462 = vmatprep.mubr.msk.f32.mxu0 %vm143_vm9, %v702_v30  ;;  %v2747_v56 = vld [vmem:[#allocation3] sm:$0xff]  }
 0x21c   :  { %v719_v61 = vsub.f32 %v1759_v46, %v2727_v18  ;;  %v1061_v46 = vsub.f32 -1.0, %v2522_v57  ;;  %v1063_v57 = vsub.f32 -1.0, %v2557_v23  ;;  %v3043_v17 = vmov %v2747_v56 }
 0x21d   :  { %v703_v33 = vsub.f32 %v1760_v40, %v2731_v58 }
 0x21e   :  { %1487 = vmatmul.mubr.msk.f32.gmra.mrb[14].mxu1 %vm143_vm9, %v719_v61 }
 0x21f   :  { %1463 = vmatmul.mubr.msk.f32.gmra.mrb[14].mxu0 %vm143_vm9, %v703_v33 }
 0x2a8   :  { %v1443_v39 = vpop.f32.mrb[0].mxu0 }
 0x2a9   :  { %v1077_v19 = vsel %vm1918_vm3, %v1043_v29, %v1443_v39  ;;  %v883_v54 = vpop.f32.mrb[1].mxu0 }
 0x2aa   :  { %v1113_v52 = vsel %vm1952_vm8, %v1077_v19, -1e+30  ;;  %v1076_v42 = vsel %vm1918_vm3, %v1042_v16, %v883_v54  ;;  %v1047_v16 = vsub.f32 -1.0, %v2561_v48  ;;  %v1062_v19 = vsub.f32 -1.0, %v2545_v2 }
 0x2ab   :  { %1145 = vst [vmem:[#allocation2 + $0x8] sm:$0xff] %v1113_v52  ;;  %v1112_v0 = vsel %vm1944_vm7, %v1076_v42, -1e+30  ;;  %v1046_v42 = vsub.f32 -1.0, %v2534_v9 }
 0x2ac   :  { %1144 = vst [vmem:[#allocation2] sm:$0xff] %v1112_v0 }
 0x2ad   :  { %v1467_v43 = vpop.f32.mrb[0].mxu1 }
 0x2ae   :  { %v1093_v7 = vsel %vm1918_vm3, %v1059_v36, %v1467_v43  ;;  %v963_v28 = vpop.f32.mrb[1].mxu1 }
 0x2af   :  { %v1129_v60 = vsel %vm1952_vm8, %v1093_v7, -1e+30  ;;  %v1092_v62 = vsel %vm1918_vm3, %v1058_v59, %v963_v28  ;;  %v1065_v28 = vsub.f32 -1.0, %v2595_v41 }
 0x2b0   :  { %1161 = vst [vmem:[#allocation2 + $0x88] sm:$0xff] %v1129_v60  ;;  %v1128_v32 = vsel %vm1944_vm7, %v1092_v62, -1e+30  ;;  %v1049_v60 = vsub.f32 -1.0, %v2599_v53 }
 0x2b1   :  { %1160 = vst [vmem:[#allocation2 + $0x80] sm:$0xff] %v1128_v32  ;;  %v1064_v32 = vsub.f32 -1.0, %v2575_v38 }
 0x2b8   :  { %v1446_v49 = vpop.f32.mrb[2].mxu0 }
 0x2b9   :  { %v1079_v26 = vsel %vm1918_vm3, %v1045_v6, %v1446_v49  ;;  %v893_v27 = vpop.f32.mrb[3].mxu0 }
 0x2ba   :  { %v1115_v51 = vsel %vm1952_vm8, %v1079_v26, -1e+30  ;;  %v1078_v50 = vsel %vm1918_vm3, %v1044_v3, %v893_v27  ;;  %v1048_v3 = vsub.f32 -1.0, %v2579_v35 }
 0x2bb   :  { %1147 = vst [vmem:[#allocation2 + $0x18] sm:$0xff] %v1115_v51  ;;  %v1114_v30 = vsel %vm1944_vm7, %v1078_v50, -1e+30 }
 0x2bc   :  { %1146 = vst [vmem:[#allocation2 + $0x10] sm:$0xff] %v1114_v30  ;;  %v1470_v4 = vpop.f32.mrb[2].mxu1 }
 0x2bd   :  { %v1095_v61 = vsel %vm1918_vm3, %v1061_v46, %v1470_v4  ;;  %v973_v40 = vpop.f32.mrb[3].mxu1  ;;  %v1067_v46 = vsub.f32 -1.0, %v2629_v31  ;;  %v1051_v4 = vsub.f32 -1.0, %v2633_v34 }
 0x2be   :  { %v1131_v33 = vsel %vm1952_vm8, %v1095_v61, -1e+30  ;;  %v1094_v29 = vsel %vm1918_vm3, %v1060_v24, %v973_v40  ;;  %v1066_v61 = vsub.f32 -1.0, %v2612_v37 }
 0x2bf   :  { %1163 = vst [vmem:[#allocation2 + $0x98] sm:$0xff] %v1131_v33  ;;  %v1130_v39 = vsel %vm1944_vm7, %v1094_v29, -1e+30  ;;  %v1050_v29 = vsub.f32 -1.0, %v2616_v47 }
 0x2c0   :  { %1162 = vst [vmem:[#allocation2 + $0x90] sm:$0xff] %v1130_v39 }
 0x2c8   :  { %v1473_v55 = vpop.f32.mrb[4].mxu1 }
 0x2c9   :  { %v1449_v54 = vpop.f32.mrb[4].mxu0  ;;  %v1097_v52 = vsel %vm1918_vm3, %v1063_v57, %v1473_v55  ;;  %v983_v0 = vpop.f32.mrb[5].mxu1 }
 0x2ca   :  { %v1081_v36 = vsel %vm1918_vm3, %v1047_v16, %v1449_v54  ;;  %v1133_v43 = vsel %vm1952_vm8, %v1097_v52, -1e+30  ;;  %v903_v59 = vpop.f32.mrb[5].mxu0  ;;  %v1096_v23 = vsel %vm1918_vm3, %v1062_v19, %v983_v0  ;;  %v1069_v54 = vsub.f32 -1.0, %v2663_v8 }
 0x2cb   :  { %v1117_v2 = vsel %vm1952_vm8, %v1081_v36, -1e+30  ;;  %1165 = vst [vmem:[#allocation2 + $0xa8] sm:$0xff] %v1133_v43  ;;  %v1080_v48 = vsel %vm1918_vm3, %v1046_v42, %v903_v59  ;;  %v1132_v9 = vsel %vm1944_vm7, %v1096_v23, -1e+30  ;;  %v1053_v52 = vsub.f32 -1.0, %v2667_v22 }
 0x2cc   :  { %1149 = vst [vmem:[#allocation2 + $0x28] sm:$0xff] %v1117_v2  ;;  %v1116_v7 = vsel %vm1944_vm7, %v1080_v48, -1e+30  ;;  %1164 = vst [vmem:[#allocation2 + $0xa0] sm:$0xff] %v1132_v9  ;;  %v1068_v0 = vsub.f32 -1.0, %v2646_v45  ;;  %v1052_v59 = vsub.f32 -1.0, %v2650_v25 }
 0x2cd   :  { %1148 = vst [vmem:[#allocation2 + $0x20] sm:$0xff] %v1116_v7 }
 0x2d1   :  { %v1476_v62 = vpop.f32.mrb[6].mxu1 }
 0x2d2   :  { %v1452_v6 = vpop.f32.mrb[6].mxu0  ;;  %v1099_v49 = vsel %vm1918_vm3, %v1065_v28, %v1476_v62  ;;  %v993_v26 = vpop.f32.mrb[7].mxu1  ;;  %v1071_v28 = vsub.f32 -1.0, %v2695_v1 }
 0x2d3   :  { %v1083_v27 = vsel %vm1918_vm3, %v1049_v60, %v1452_v6  ;;  %v1135_v51 = vsel %vm1952_vm8, %v1099_v49, -1e+30  ;;  %v913_v50 = vpop.f32.mrb[7].mxu0  ;;  %v1098_v41 = vsel %vm1918_vm3, %v1064_v32, %v993_v26  ;;  %v1055_v60 = vsub.f32 -1.0, %v2699_v20 }
 0x2d4   :  { %v1119_v38 = vsel %vm1952_vm8, %v1083_v27, -1e+30  ;;  %1167 = vst [vmem:[#allocation2 + $0xb8] sm:$0xff] %v1135_v51  ;;  %v1082_v53 = vsel %vm1918_vm3, %v1048_v3, %v913_v50  ;;  %v1134_v35 = vsel %vm1944_vm7, %v1098_v41, -1e+30  ;;  %v1070_v32 = vsub.f32 -1.0, %v2679_v21 }
 0x2d5   :  { %1151 = vst [vmem:[#allocation2 + $0x38] sm:$0xff] %v1119_v38  ;;  %v1118_v30 = vsel %vm1944_vm7, %v1082_v53, -1e+30  ;;  %1166 = vst [vmem:[#allocation2 + $0xb0] sm:$0xff] %v1134_v35  ;;  %v1054_v3 = vsub.f32 -1.0, %v2683_v63  ;;  %v1073_v38 = vsub.f32 -1.0, %v2727_v18 }
 0x2d6   :  { %1150 = vst [vmem:[#allocation2 + $0x30] sm:$0xff] %v1118_v30  ;;  %v1057_v53 = vsub.f32 -1.0, %v2731_v58  ;;  %v1072_v30 = vsub.f32 -1.0, %v2711_v44 }
 0x2d8   :  { %v1479_v24 = vpop.f32.mrb[8].mxu1 }
 0x2d9   :  { %v1455_v40 = vpop.f32.mrb[8].mxu0  ;;  %v1101_v33 = vsel %vm1918_vm3, %v1067_v46, %v1479_v24  ;;  %v1003_v39 = vpop.f32.mrb[9].mxu1  ;;  %v1056_v24 = vsub.f32 -1.0, %v2715_v13 }
 0x2da   :  { %v1085_v57 = vsel %vm1918_vm3, %v1051_v4, %v1455_v40  ;;  %v1137_v16 = vsel %vm1952_vm8, %v1101_v33, -1e+30  ;;  %v923_v55 = vpop.f32.mrb[9].mxu0  ;;  %v1100_v31 = vsel %vm1918_vm3, %v1066_v61, %v1003_v39 }
 0x2db   :  { %v1121_v37 = vsel %vm1952_vm8, %v1085_v57, -1e+30  ;;  %1169 = vst [vmem:[#allocation2 + $0xc8] sm:$0xff] %v1137_v16  ;;  %v1084_v34 = vsel %vm1918_vm3, %v1050_v29, %v923_v55  ;;  %v1136_v47 = vsel %vm1944_vm7, %v1100_v31, -1e+30  ;;  %v3042_v57 = vmov %v2749_v14 }
 0x2dc   :  { %1153 = vst [vmem:[#allocation2 + $0x48] sm:$0xff] %v1121_v37  ;;  %v1120_v19 = vsel %vm1944_vm7, %v1084_v34, -1e+30  ;;  %1168 = vst [vmem:[#allocation2 + $0xc0] sm:$0xff] %v1136_v47 }
 0x2dd   :  { %1152 = vst [vmem:[#allocation2 + $0x40] sm:$0xff] %v1120_v19 }
 0x2e1   :  { %v1482_v42 = vpop.f32.mrb[10].mxu1 }
 0x2e2   :  { %v1458_v36 = vpop.f32.mrb[10].mxu0  ;;  %v1103_v43 = vsel %vm1918_vm3, %v1069_v54, %v1482_v42  ;;  %v1013_v23 = vpop.f32.mrb[11].mxu1 }
 0x2e3   :  { %v1087_v2 = vsel %vm1918_vm3, %v1053_v52, %v1458_v36  ;;  %v1139_v48 = vsel %vm1952_vm8, %v1103_v43, -1e+30  ;;  %v933_v9 = vpop.f32.mrb[11].mxu0  ;;  %v1102_v8 = vsel %vm1918_vm3, %v1068_v0, %v1013_v23 }
 0x2e4   :  { %v1123_v45 = vsel %vm1952_vm8, %v1087_v2, -1e+30  ;;  %1171 = vst [vmem:[#allocation2 + $0xd8] sm:$0xff] %v1139_v48  ;;  %v1086_v22 = vsel %vm1918_vm3, %v1052_v59, %v933_v9  ;;  %v1138_v25 = vsel %vm1944_vm7, %v1102_v8, -1e+30 }
 0x2e5   :  { %1155 = vst [vmem:[#allocation2 + $0x58] sm:$0xff] %v1123_v45  ;;  %v1122_v7 = vsel %vm1944_vm7, %v1086_v22, -1e+30  ;;  %1170 = vst [vmem:[#allocation2 + $0xd0] sm:$0xff] %v1138_v25 }
 0x2e6   :  { %1154 = vst [vmem:[#allocation2 + $0x50] sm:$0xff] %v1122_v7 }
 0x2e9   :  { %v1485_v62 = vpop.f32.mrb[12].mxu1 }
 0x2ea   :  { %v1461_v6 = vpop.f32.mrb[12].mxu0  ;;  %v1105_v49 = vsel %vm1918_vm3, %v1071_v28, %v1485_v62  ;;  %v1023_v26 = vpop.f32.mrb[13].mxu1 }
 0x2eb   :  { %v1089_v27 = vsel %vm1918_vm3, %v1055_v60, %v1461_v6  ;;  %v1141_v51 = vsel %vm1952_vm8, %v1105_v49, -1e+30  ;;  %v943_v50 = vpop.f32.mrb[13].mxu0  ;;  %v1104_v1 = vsel %vm1918_vm3, %v1070_v32, %v1023_v26 }
 0x2ec   :  { %v1125_v21 = vsel %vm1952_vm8, %v1089_v27, -1e+30  ;;  %1173 = vst [vmem:[#allocation2 + $0xe8] sm:$0xff] %v1141_v51  ;;  %v1088_v20 = vsel %vm1918_vm3, %v1054_v3, %v943_v50  ;;  %v1140_v63 = vsel %vm1944_vm7, %v1104_v1, -1e+30 }
 0x2ed   :  { %1157 = vst [vmem:[#allocation2 + $0x68] sm:$0xff] %v1125_v21  ;;  %v1124_v41 = vsel %vm1944_vm7, %v1088_v20, -1e+30  ;;  %1172 = vst [vmem:[#allocation2 + $0xe0] sm:$0xff] %v1140_v63 }
 0x2ee   :  { %1156 = vst [vmem:[#allocation2 + $0x60] sm:$0xff] %v1124_v41 }
 0x2f0   :  { %1358 = sbr.rel (%p1366_p0) target bundleno = 926 (0x39e), region = 50 }
 0x2f1   :  { %v1488_v35 = vpop.f32.mrb[14].mxu1 }
 0x2f2   :  { %v1464_v46 = vpop.f32.mrb[14].mxu0  ;;  %v1107_v4 = vsel %vm1918_vm3, %v1073_v38, %v1488_v35  ;;  %v1033_v61 = vpop.f32.mrb[15].mxu1 }
 0x2f3   :  { %v1091_v40 = vsel %vm1918_vm3, %v1057_v53, %v1464_v46  ;;  %v1143_v33 = vsel %vm1952_vm8, %v1107_v4, -1e+30  ;;  %v953_v29 = vpop.f32.mrb[15].mxu0  ;;  %v1106_v18 = vsel %vm1918_vm3, %v1072_v30, %v1033_v61 }
 0x2f4   :  { %v1127_v44 = vsel %vm1952_vm8, %v1091_v40, -1e+30  ;;  %1175 = vst [vmem:[#allocation2 + $0xf8] sm:$0xff] %v1143_v33  ;;  %v1090_v58 = vsel %vm1918_vm3, %v1056_v24, %v953_v29  ;;  %v1142_v13 = vsel %vm1944_vm7, %v1106_v18, -1e+30 }
 0x2f5   :  { %1159 = vst [vmem:[#allocation2 + $0x78] sm:$0xff] %v1127_v44  ;;  %v1126_v39 = vsel %vm1944_vm7, %v1090_v58, -1e+30  ;;  %1174 = vst [vmem:[#allocation2 + $0xf0] sm:$0xff] %v1142_v13 }
 0x2f6   :  { %1158 = vst [vmem:[#allocation2 + $0x70] sm:$0xff] %v1126_v39 }
 0x2f7 LB: > { %v1861_v10 = vmov 0   ;;  %s1862_s0 = smov 1   ;;  %s1863_s17 = smov 2   ;;  %v1246_v15 = vstv %s1847_s16  ;;  %s1847_s16 = sphi %s2932_s16, %s1184_s16   ;;  %v1843_v56 = vphi %v2747_v56, %v3046_v56   ;;  %v1839_v14 = vphi %v2749_v14, %v3045_v14  }
 0x2f8   : > { %1761 = vset.pattern.permute.xlu0 %v1861_v10  ;;  %1762 = vset.pattern.permute.xlu1 %v1861_v10  ;;  %vm1247_vm12 = vcmp.lt.s32.totalorder %v1246_v15, %v1929_v11  ;;  %vm1248_vm13 = vcmp.lt.s32.totalorder %v1246_v15, %v1934_v12  ;;  %s1400_s18 = sshll.u32 %s1847_s16, 4  ;;  %s1184_s16 = sadd.s32 1, %s1847_s16  }
 0x2f9   : > { %1193 = vrot.lane.b32.xlu0 %v1843_v56, %s1862_s0  ;;  %1201 = vrot.lane.b32.xlu1 %v1843_v56, %s1863_s17  ;;  %v1249_v16 = vsel %vm1247_vm12, 1, %v1861_v10  ;;  %v1250_v55 = vsel %vm1248_vm13, 1, %v1861_v10  ;;  %s1190_s19 = scalar_lea.vmem [#allocation2], %s1400_s18  ;;  %p1183_p2 = scmp.ge.s32.totalorder %s1184_s16, %s2754_s2 }
 0x2fd   : > { %1195 = vrot.lane.b32.xlu0 %v1839_v14, %s1862_s0  ;;  %1203 = vrot.lane.b32.xlu1 %v1839_v14, %s1863_s17  ;;  %v1191_v38 = vld [vmem:[%s1190_s19] sm:$0xff]  ;;  %v1192_v24 = vld [vmem:[%s1190_s19 + $0x8] sm:$0xff] }
 0x301   : > { %1252 = vperm.xlu0 %1761, %v1249_v16   ;;  %1255 = vperm.xlu1 %1762, %v1250_v55  }
 0x36b   : > { %v1194_v31 = vpop.permute.xlu0 %1193  ;;  %v1202_v37 = vpop.permute.xlu1 %1201 }
 0x36c   : > { %v1199_v34 = vsel %vm39_vm0, %v1194_v31, -1e+30  ;;  %v1207_v19 = vsel %vm1936_vm6, %v1202_v37, -1e+30 }
 0x36d   : > { %v1209_v54 = vmax.f32 %v1843_v56, %v1199_v34 }
 0x36f   : > { %v1211_v52 = vmax.f32 %v1209_v54, %v1207_v19  ;;  %v1196_v42 = vpop.permute.xlu0 %1195  ;;  %v1204_v0 = vpop.permute.xlu1 %1203 }
 0x370   : > { %v1200_v36 = vsel %vm39_vm0, %v1196_v42, -1e+30  ;;  %v1208_v43 = vsel %vm1936_vm6, %v1204_v0, -1e+30 }
 0x371   : > { %v1213_v59 = vsub.f32 %v1843_v56, %v1211_v52  ;;  %v1219_v23 = vsub.f32 %v1199_v34, %v1211_v52  ;;  %v1227_v2 = vsub.f32 %v1207_v19, %v1211_v52  ;;  %v1210_v48 = vmax.f32 %v1839_v14, %v1200_v36 }
 0x373   : > { %v1215_v9 = vmul.f32 1.442695, %v1213_v59  ;;  %v1221_v8 = vmul.f32 1.442695, %v1219_v23  ;;  %v1212_v45 = vmax.f32 %v1210_v48, %v1208_v43  ;;  %v1229_v22 = vmul.f32 1.442695, %v1227_v2 }
 0x375   : > { %1763 = vpow2.f32 %v1215_v9  ;;  %v1214_v25 = vsub.f32 %v1839_v14, %v1212_v45  ;;  %v1220_v7 = vsub.f32 %v1200_v36, %v1212_v45  ;;  %v1228_v28 = vsub.f32 %v1208_v43, %v1212_v45 }
 0x376   : > { %1765 = vpow2.f32 %v1221_v8 }
 0x377   : > { %v1217_v60 = vmul.f32 1.442695, %v1214_v25  ;;  %v1223_v62 = vmul.f32 1.442695, %v1220_v7  ;;  %1767 = vpow2.f32 %v1229_v22  ;;  %v1231_v32 = vmul.f32 1.442695, %v1228_v28 }
 0x379   : > { %1769 = vpow2.f32 %v1217_v60 }
 0x37a   : > { %1771 = vpow2.f32 %v1223_v62 }
 0x37b   : > { %1773 = vpow2.f32 %v1231_v32 }
 0x37f   : > { %v1764_v6 = vpop.eup %1763 }
 0x380   : > { %v1766_v49 = vpop.eup %1765  ;;  %v1253_v35 = vpop.permute.xlu0 %1252 }
 0x381   : > { %v1225_v3 = vadd.f32 %v1766_v49, %v1764_v6  ;;  %v1768_v26 = vpop.eup %1767  ;;  %vm1257_vm14 = vcmp.eq.s32.totalorder %v1253_v35, 1  ;;  %v1256_v40 = vpop.permute.xlu1 %1255 }
 0x382   : > { %vm1258_vm15 = vcmp.eq.s32.totalorder %v1256_v40, 1 }
 0x383   : > { %v1770_v27 = vpop.eup %1769  ;;  %v1233_v51 = vadd.f32 %v1768_v26, %v1225_v3 }
 0x384   : > { %v1772_v50 = vpop.eup %1771 }
 0x385   : > { %v1226_v1 = vadd.f32 %v1772_v50, %v1770_v27  ;;  %1775 = vlog2.f32 %v1233_v51  ;;  %v1774_v21 = vpop.eup %1773 }
 0x387   : > { %v1234_v20 = vadd.f32 %v1774_v21, %v1226_v1 }
 0x389   : > { %1777 = vlog2.f32 %v1234_v20 }
 0x38f   : > { %v1776_v63 = vpop.eup %1775 }
 0x390   : > { %v1236_v41 = vmul.f32 0.6931472, %v1776_v63 }
 0x392   : > { %v1239_v53 = vadd.f32 %v1236_v41, %v1211_v52 }
 0x393   : > { %v1778_v30 = vpop.eup %1777 }
 0x394   : > { %v1241_v46 = vadd.f32 %v1239_v53, %v1191_v38  ;;  %v1238_v4 = vmul.f32 0.6931472, %v1778_v30 }
 0x396   : > { %v1243_v61 = vmax.f32 %v1241_v46, -1e+30  ;;  %v1240_v33 = vadd.f32 %v1238_v4, %v1212_v45 }
 0x397   :  { %1186 = sbr.rel (!%p1183_p2) target bundleno = 759 (0x2f7), region = 56 }
 0x398   : > { %v1259_v29 = vsel %vm1257_vm14, %v1243_v61, %v1843_v56   ;;  %v1242_v18 = vadd.f32 %v1240_v33, %v1192_v24 }
 0x399   : > { %v3046_v56 = vmov %v1259_v29  ;;  %v3048_v17 = vmov (%p1183_p2), %v1259_v29 }
 0x39a   : > { %v1244_v44 = vmax.f32 %v1242_v18, -1e+30 }
 0x39c   : > { %v1260_v58 = vsel %vm1258_vm15, %v1244_v44, %v1839_v14  }
 0x39d   : > { %v3045_v14 = vmov %v1260_v58  ;;  %v3047_v57 = vmov (%p1183_p2), %v1260_v58 }
 0x39e PF:  { %1261 = vst [vmem:[#allocation3] sm:$0xff] %v1855_v17  ;;  %1262 = vst [vmem:[#allocation3 + $0x8] sm:$0xff] %v1851_v57  ;;  %v1855_v17 = vphi %v3043_v17, %v3048_v17   ;;  %v1851_v57 = vphi %v3042_v57, %v3047_v57  }
 0x39f PF:  { %v3049_v56 = vmov 0   ;;  %v3050_v13 = vld [vmem:[#allocation9_spill] sm:$0xff]  ;;  %v3052_v11 = vld [vmem:[#allocation10_spill] sm:$0xff]  ;;  %s1864_s20 = smov [#allocation6]  }
 0x3a0   :  { %1779 = vset.pattern.permute.xlu0 %v3049_v56  ;;  %v3051_v39 = vmul.u32 2, %v3050_v13  ;;  %1780 = vset.pattern.permute.xlu1 %v3049_v56  ;;  %v3053_v12 = vmul.u32 2, %v3052_v11  ;;  %vm1314_vm6 = vcmp.gt.s32.totalorder %v3050_v13, 1  ;;  %vm1316_vm7 = vcmp.gt.s32.totalorder %v3052_v11, 1  ;;  %s1341_s21 = sshll.u32 %s1864_s20, 4  ;;  %s1342_s21 = int_to_ptr.vmem [resolvable:$true] %s1341_s21 }
 0x3a1   :  { %v3054_v15 = vld [vmem:[#allocation12_spill] sm:$0xff]  ;;  %v1317_v48 = vsel %vm1316_vm7, %v3052_v11, 1  ;;  %s1793_s3 = scalar_lea.vmem %s1342_s21, 256  ;;  %p1798_p4 = scmp.lt.s32.totalorder %s1342_s21, %s1342_s21 }
 0x3a2   :  { %v1401_v10 = vadd.s32 4294967295, %v3051_v39  ;;  %v1402_v14 = vadd.s32 4294967295, %v3053_v12  ;;  %vm1268_vm0 = vcmp.eq.s32.totalorder %v1909_v5, %v3054_v15  ;;  %v1319_v9 = vcvt.s32.f32 %v1317_v48  ;;  %p1794_p3 = scmp.ne.s32.totalorder %s1342_s21, %s1793_s3  ;;  %p1799_p5 = scmp.lt.s32.totalorder %s1793_s3, %s1793_s3 }
 0x3a4   :  { %1273 = vperm.xlu0 %1779, %v1401_v10   ;;  %p1800_p6 = por %p1799_p5, %p1798_p4 }
 0x3a5   :  { %v1266_v55 = vld [vmem:[#allocation3] sm:$0xff]  ;;  %v1267_v37 = vld [vmem:[#allocation3 + $0x8] sm:$0xff] }
 0x3a6   :  { %v3055_v17 = vld [vmem:[#allocation13_spill] sm:$0xff]  ;;  %p1801_p7 = pnand %p1800_p6, %p1794_p3 }
 0x3a7   :  { %vm1269_vm3 = vcmp.eq.s32.totalorder %v1909_v5, %v3055_v17 }
 0x3a8   :  { %1276 = vperm.xlu0 %1779, %v1402_v14  }
 0x423   :  { %v1274_v16 = vpop.permute.xlu0 %1273 }
 0x424   :  { %vm1278_vm1 = vcmp.eq.s32.totalorder %v1909_v5, %v1274_v16 }
 0x425   :  { %vm1280_vm2 = vmor %vm1268_vm0, %vm1278_vm1 }
 0x426   :  { %v1282_v57 = vsel %vm1280_vm2, %v1266_v55, -1e+30 }
 0x427   :  { %v1277_v31 = vpop.permute.xlu0 %1276  ;;  %1284 = vmax.xlane.f32.xlu1 %v1282_v57 }
 0x428   :  { %vm1279_vm4 = vcmp.eq.s32.totalorder %v1909_v5, %v1277_v31  ;;  %v1315_v5 = vsel %vm1314_vm6, %v3050_v13, 1 }
 0x429   :  { %vm1281_vm5 = vmor %vm1269_vm3, %vm1279_vm4  ;;  %v1318_v2 = vcvt.s32.f32 %v1315_v5 }
 0x42a   :  { %v1283_v34 = vsel %vm1281_vm5, %v1267_v37, -1e+30 }
 0x42b   :  { %1286 = vmax.xlane.f32.xlu1 %v1283_v34 }
 0x4b4   :  { %v1285_v47 = vpop.xlane.xlu1 %1284 }
 0x4b5   :  { %v1288_v19 = vsub.f32 %v1282_v57, %v1285_v47 }
 0x4b7   :  { %v1290_v54 = vmul.f32 1.442695, %v1288_v19 }
 0x4b8   :  { %v1287_v52 = vpop.xlane.xlu1 %1286 }
 0x4b9   :  { %1781 = vpow2.f32 %v1290_v54  ;;  %v1289_v42 = vsub.f32 %v1283_v34, %v1287_v52 }
 0x4bb   :  { %v1292_v0 = vmul.f32 1.442695, %v1289_v42 }
 0x4bd   :  { %1783 = vpow2.f32 %v1292_v0 }
 0x4c3   :  { %v1782_v36 = vpop.eup %1781 }
 0x4c4   :  { %1294 = vadd.xlane.f32.xlu0 %v1782_v36 }
 0x4c7   :  { %v1784_v43 = vpop.eup %1783 }
 0x4c8   :  { %1296 = vadd.xlane.f32.xlu1 %v1784_v43 }
 0x551   :  { %v1295_v59 = vpop.xlane.xlu0 %1294 }
 0x552   :  { %1785 = vlog2.f32 %v1295_v59 }
 0x555   :  { %v1297_v23 = vpop.xlane.xlu1 %1296 }
 0x556   :  { %1787 = vlog2.f32 %v1297_v23 }
 0x557   :  { %1789 = vrcp.f32 %v1318_v2 }
 0x558   :  { %1791 = vrcp.f32 %v1319_v9 }
 0x55c   :  { %v1786_v8 = vpop.eup %1785 }
 0x55d   :  { %v1299_v45 = vmul.f32 0.6931472, %v1786_v8 }
 0x55f   :  { %v1302_v22 = vadd.f32 %v1299_v45, %v1285_v47 }
 0x560   :  { %v1788_v25 = vpop.eup %1787 }
 0x561   :  { %v1304_v7 = vsub.f32 0.0, %v1302_v22  ;;  %v1301_v28 = vmul.f32 0.6931472, %v1788_v25  ;;  %v1790_v60 = vpop.eup %1789 }
 0x562   :  { %v1792_v3 = vpop.eup %1791 }
 0x563   :  { %v1303_v62 = vadd.f32 %v1301_v28, %v1287_v52  ;;  %vm1306_vm8 = vcmp.gt.f32.partialorder %v1304_v7, 1e+20  ;;  %vm1308_vm9 = vcmp.ne.f32.partialorder %v1304_v7, %v1304_v7 }
 0x564   :  { %vm1310_vm10 = vmor %vm1306_vm8, %vm1308_vm9 }
 0x565   :  { %v1305_v32 = vsub.f32 0.0, %v1303_v62  ;;  %v1312_v6 = vsel %vm1310_vm10, 0.0, %v1304_v7 }
 0x566   :  { %v1321_v49 = vmul.f32 %v1790_v60, %v1312_v6 }
 0x567   :  { %vm1307_vm11 = vcmp.gt.f32.partialorder %v1305_v32, 1e+20  ;;  %vm1309_vm12 = vcmp.ne.f32.partialorder %v1305_v32, %v1305_v32 }
 0x568   :  { %1326 = vperm.xlu1 %1780, %v1321_v49   ;;  %vm1311_vm13 = vmor %vm1307_vm11, %vm1309_vm12 }
 0x569   :  { %v1313_v26 = vsel %vm1311_vm13, 0.0, %v1305_v32 }
 0x56a   :  { %v1323_v27 = vmul.f32 %v1792_v3, %v1313_v26 }
 0x56c   :  { %1331 = vperm.xlu1 %1780, %v1323_v27  }
 0x5e7   :  { %v1327_v51 = vpop.permute.xlu1 %1326 }
 0x5e8   :  { %1334 = vst [vmem:[#allocation6] sm:$0xff] %v1327_v51 }
 0x5eb   :  { %v1332_v50 = vpop.permute.xlu1 %1331 }
 0x5ec   :  { %1335 = vst [vmem:[#allocation6 + $0x8] sm:$0xff] %v1332_v50 }
 0x5ed   :  { %1804 = shalt.err (!%p1801_p7)
}
 0x5ee   :  { %s1805_s24 = scalar_lea.hbm %s3012_s5, 256 }
 0x5ef   :  { %p1806_p8 = scmp.ne.s32.totalorder %s3012_s5, %s1805_s24  ;;  %p1809_p9 = scmp.lt.u32.totalorder %s1805_s24, %s3012_s5 }
 0x5f1   :  { %p1811_p10 = pnand %p1809_p9, %p1806_p8 }
 0x5f3   :  { %1814 = shalt.err (!%p1811_p10)
}
 0x5f4   :  { %s1865_s28 = smov 128   ;;  %s1866_s29 = smov 8  }
 0x5f5   :  { %1347 = dma.vmem_to_hbm [thread:$0]  %s1342_s21, 256, %s3012_s5, [#allocation7], %s1865_s28, %s1865_s28, %s1866_s29  }
 0x5f6   :  { %1835 = dma.done.wait [#allocation7], 256  }
 0x5f7   :  { %1836 = vsyncadd [#allocation7], 4294967040 }
 0x5f8   :  { %1351 = vsyncpa [#allocation7], 1 }

</bundles_post_ra>
